<compile_context>
chip_gen: v6e
topology: v6e:2x2x1
jax: 0.10.0
libtpu: 0.0.40
codegen_flags: <defaults>
</compile_context>

<pallas_src>
import functools

import numpy as np
import jax
import jax.numpy as jnp
from jax.experimental import pallas as pl
from jax.experimental.pallas import tpu as pltpu


def _round_up(x, m):
    return ((x + m - 1) // m) * m


def _default_tile():
    # 128 frame-rows per step on v5e (128x128 MXU), 256 on v6e/v7x (256x256 MXU).
    try:
        kind = jax.devices()[0].device_kind.lower()
        if "v5 lite" in kind or "v5e" in kind or "v5litepod" in kind:
            return 128
    except Exception:
        pass
    return 256


def _vmem_cap_bytes():
    # Per-TensorCore VMEM headroom: v7x has 64 MiB/TC, v5e/v6e have 128 MiB.
    cap = 56 * 2**20
    try:
        kind = jax.devices()[0].device_kind.lower()
        if "v7" not in kind:
            cap = 100 * 2**20
    except Exception:
        pass
    return cap


# ----------------------------------------------------------------------------
# Deterministic CheapTrick tables (buffers, no learned parameters).
# ----------------------------------------------------------------------------
def _cheaptrick_tables(sampling_rate, fft_size, f0_floor, f0_ceil, qb,
                       q1=-0.15, elim_0th=False):
    """Adaptive window table + combined (smoothing * compensation / fft_size) lifter table."""
    bins = fft_size // 2 + 1
    window = np.zeros((f0_ceil + 1, fft_size), np.float32)
    lifter = np.zeros((f0_ceil + 1, qb), np.float32)   # zero-padded quefrency lanes
    q0 = 1.0 - 2.0 * q1
    for f0 in range(f0_floor, f0_ceil + 1):
        half = round(1.5 * sampling_rate / f0)
        base = np.arange(-half, half + 1, dtype=np.float64)
        pos = base / 1.5 / sampling_rate
        w = np.zeros(fft_size, np.float64)
        left = fft_size // 2 - half
        right = fft_size // 2 + half + 1
        w[left:right] = 0.5 * np.cos(np.pi * pos * f0) + 0.5
        w = w / np.sqrt(np.sum(w * w))
        window[f0] = w.astype(np.float32)

        quef = np.arange(1, bins, dtype=np.float64) / sampling_rate
        sm = np.ones(bins, np.float64)
        sm[1:] = np.sin(np.pi * f0 * quef) / (np.pi * f0 * quef)
        cl = np.full(bins, q0 + 2.0 * q1, np.float64)
        cl[1:] = q0 + 2.0 * q1 * np.cos(2.0 * np.pi * f0 * quef)
        # TODO(synk): exact usfgan torch envelope scaling assumed to be the exact inverse
        # cosine transform (1/fft_size); that scale is folded into the lifter here.
        lf = sm * cl / fft_size
        if elim_0th:
            lf[0] = 0.0
        lifter[f0, :bins] = lf.astype(np.float32)
    return window, lifter


def _radix2_matrices(fft_size, ne_pad, no_pad, qb):
    """Radix-2 half-size real-DFT matrices + permuted/natural symmetric cosine transforms.

    Even bins k=2p come from a = x[:N/2]+x[N/2:], odd bins k=2p+1 from b = x[:N/2]-x[N/2:].
    The forward cosine transform is split into an even-bin block and an odd-bin block so
    no lane interleave is ever needed inside the kernel. Padded rows/cols are exactly zero.
    """
    N = fft_size
    half = N // 2
    bins = half + 1
    ne = N // 4 + 1
    no = N // 4

    n = np.arange(half)[:, None]
    # even bins: angle 2*pi*n*(2p)/N = 2*pi*n*p/(N/2)
    p_e = np.arange(ne)[None, :]
    ang_e = 2.0 * np.pi * ((n * p_e) % half) / half
    ce = np.zeros((half, 2 * ne_pad), np.float32)
    ce[:, :ne] = np.cos(ang_e)
    ce[:, ne_pad:ne_pad + ne] = np.sin(ang_e)
    # odd bins: angle 2*pi*n*(2p+1)/N
    p_o = np.arange(no)[None, :]
    ang_o = 2.0 * np.pi * ((n * (2 * p_o + 1)) % N) / N
    co = np.zeros((half, 2 * no_pad), np.float32)
    co[:, :no] = np.cos(ang_o)
    co[:, no_pad:no_pad + no] = np.sin(ang_o)

    # natural symmetric cosine transform: cnat[m, k] = wgt(m) * cos(2*pi*m*k/N)
    # (forward spectrum->cepstrum uses its rows permuted to even/odd bin order;
    #  inverse cepstrum->envelope uses the natural order; 1/N is folded into the lifter.)
    m = np.arange(bins)[:, None]
    k = np.arange(bins)[None, :]
    ang2 = 2.0 * np.pi * ((m * k) % N) / N
    wgt = np.where((m == 0) | (m == half), 1.0, 2.0)
    cnat_full = (wgt * np.cos(ang2)).astype(np.float32)          # (bins, bins)

    cnat = np.zeros((qb, qb), np.float32)
    cnat[:bins, :bins] = cnat_full
    cfe = np.zeros((ne_pad, qb), np.float32)
    cfe[:ne, :bins] = cnat_full[0::2, :]                          # even bins k = 2p
    cfo = np.zeros((no_pad, qb), np.float32)
    cfo[:no, :bins] = cnat_full[1::2, :]                          # odd bins  k = 2p+1
    return ce, co, cfe, cfo, cnat


# ----------------------------------------------------------------------------
# Pallas kernel: window -> radix-2 power spectrum -> cepstrum -> liftering
#                -> envelope -> |.| / (.)^2 partial sum per grid step.
# ----------------------------------------------------------------------------
def _flatten_loss_kernel(frames_ref, win_ref, lift_ref, ce_ref, co_ref,
                         cfe_ref, cfo_ref, cnat_ref, out_ref,
                         *, power, l2_norm, half, ne_pad, no_pad):
    tile = frames_ref.shape[0]
    bb = cnat_ref.shape[1]

    # adaptive windowing (f32 on VPU) + radix-2 fold of the time axis
    wx = frames_ref[...].astype(jnp.float32) * win_ref[...].astype(jnp.float32)
    x0 = wx[:, :half]
    x1 = wx[:, half:]
    a = (x0 + x1).astype(jnp.bfloat16)          # -> even spectral bins
    b = (x0 - x1).astype(jnp.bfloat16)          # -> odd spectral bins

    # half-size real DFTs (single MXU pass each for cos & sin parts)
    ri_e = jnp.dot(a, ce_ref[...], preferred_element_type=jnp.float32)   # (tile, 2*ne_pad)
    ri_o = jnp.dot(b, co_ref[...], preferred_element_type=jnp.float32)   # (tile, 2*no_pad)
    pw_e = ri_e[:, :ne_pad] ** 2 + ri_e[:, ne_pad:] ** 2
    pw_o = ri_o[:, :no_pad] ** 2 + ri_o[:, no_pad:] ** 2

    # log power spectrum -> cepstrum (forward cosine transform, rows permuted to even/odd)
    logp_e = jnp.log(jnp.maximum(pw_e, 1e-7)).astype(jnp.bfloat16)
    logp_o = jnp.log(jnp.maximum(pw_o, 1e-7)).astype(jnp.bfloat16)
    cep = (jnp.dot(logp_e, cfe_ref[...], preferred_element_type=jnp.float32)
           + jnp.dot(logp_o, cfo_ref[...], preferred_element_type=jnp.float32))

    # combined adaptive liftering (smoothing * compensation / fft_size, elim_0th baked in)
    lift = cep * lift_ref[...].astype(jnp.float32)

    # recover (log) spectral envelope in natural bin order
    env = jnp.dot(lift.astype(jnp.bfloat16), cnat_ref[...],
                  preferred_element_type=jnp.float32)
    if power:
        env = jnp.exp(env)

    vals = env * env if l2_norm else jnp.abs(env)

    # No masking needed: padded rows/lanes contribute exactly 0 (power=False) or exactly 1
    # (power=True, exp(0)); the power=True case is corrected exactly in the wrapper.
    partial = vals.reshape(tile // 8, 8, bb // 128, 128).sum(axis=0).sum(axis=1)  # (8, 128)
    out_ref[0] = partial


# ----------------------------------------------------------------------------
# FlattenLoss wrapper
# ----------------------------------------------------------------------------
class FlattenLoss:
    def __init__(self, sampling_rate=24000, hop_size=120, fft_size=2048,
                 f0_floor=70, f0_ceil=340, power=False, elim_0th=False,
                 l2_norm=False, uv_threshold=0.0, q1=-0.15, tile=None):
        assert fft_size % 128 == 0, "fft_size must be a multiple of 128"
        self.sampling_rate = sampling_rate
        self.hop_size = hop_size
        self.fft_size = fft_size
        self.bins = fft_size // 2 + 1
        self.qb = _round_up(self.bins, 128)          # quefrency / natural-bin lane width
        self.ne = fft_size // 4 + 1                  # number of even bins
        self.no = fft_size // 4                      # number of odd bins
        self.ne_pad = _round_up(self.ne, 128)
        self.no_pad = _round_up(self.no, 128)
        self.f0_floor = f0_floor
        self.f0_ceil = f0_ceil
        self.power = power
        self.elim_0th = elim_0th
        self.l2_norm = l2_norm
        self.uv_threshold = uv_threshold
        self.tile = int(tile) if tile is not None else _default_tile()
        assert self.tile % 8 == 0
        self._vmem_cap = _vmem_cap_bytes()

        win, lifter = _cheaptrick_tables(sampling_rate, fft_size, f0_floor, f0_ceil,
                                         self.qb, q1=q1, elim_0th=elim_0th)
        ce, co, cfe, cfo, cnat = _radix2_matrices(fft_size, self.ne_pad, self.no_pad, self.qb)

        # per-F0 tables stored bf16 -> gathered arrays stream at half the bytes
        self.window_table = jnp.asarray(win).astype(jnp.bfloat16)     # (f0_ceil+1, fft)
        self.lifter_table = jnp.asarray(lifter).astype(jnp.bfloat16)  # (f0_ceil+1, qb)
        # transform constants: resident bf16 in VMEM
        self.ce = jnp.asarray(ce).astype(jnp.bfloat16)                # (fft/2, 2*ne_pad)
        self.co = jnp.asarray(co).astype(jnp.bfloat16)                # (fft/2, 2*no_pad)
        self.cfe = jnp.asarray(cfe).astype(jnp.bfloat16)              # (ne_pad, qb)
        self.cfo = jnp.asarray(cfo).astype(jnp.bfloat16)              # (no_pad, qb)
        self.cnat = jnp.asarray(cnat).astype(jnp.bfloat16)            # (qb, qb)

    def _preprocess(self, s, f):
        """Glue: squeeze, F0 rounding, framing, table gathers (plain JAX, bf16 outputs)."""
        s = s[:, 0, :].astype(jnp.float32)     # (B, T)
        f = f[:, 0, :].astype(jnp.float32)     # (B, T')
        B, T = s.shape
        Tf = f.shape[-1]
        assert T // self.hop_size == Tf, "T must equal hop_size * T'"

        # unvoiced frames are mapped to f0_ceil before the table lookup (matches CheapTrick glue)
        voiced = f > self.uv_threshold
        f_proc = jnp.where(voiced, f, float(self.f0_ceil))
        f_idx = jnp.round(
            jnp.clip(f_proc, self.f0_floor, self.f0_ceil)).astype(jnp.int32)

        pad = self.fft_size // 2
        xp = jnp.pad(s, ((0, 0), (pad, pad))).astype(jnp.bfloat16)
        idx = (jnp.arange(Tf)[:, None] * self.hop_size
               + jnp.arange(self.fft_size)[None, :])
        frames = xp[:, idx]                                   # (B, T', fft)     bf16
        windows = self.window_table[f_idx]                    # (B, T', fft)     bf16
        lifter = self.lifter_table[f_idx]                     # (B, T', qb)      bf16
        return frames, windows, lifter, B, Tf

    def __call__(self, s, f):
        frames, windows, lifter, B, Tf = self._preprocess(s, f)
        fft, bins, qb = self.fft_size, self.bins, self.qb
        N = B * Tf

        frames = frames.reshape(N, fft)
        windows = windows.reshape(N, fft)
        lifter = lifter.reshape(N, qb)

        # --- VMEM budget (resident constants + double-buffered bf16 streams + f32 temps) ---
        const_bytes = 2 * (self.ce.size + self.co.size + self.cfe.size
                           + self.cfo.size + self.cnat.size)

        def _budget(t):
            stream = t * (2 * fft + qb) * 2                      # bf16 per step
            inter = t * (6 * fft + 10 * qb) * 4                  # generous f32 temporaries
            return const_bytes + 2 * stream + inter + (4 << 20)

        # tile: keep >= ~8 grid steps when possible (both v7x TCs + pipeline amortization),
        # cap at the MXU-optimal tile, shrink if the VMEM budget would exceed the per-core cap.
        tile = min(self.tile, max(8, _round_up(-(-N // 8), 8)))
        while tile > 8 and _budget(tile) > self._vmem_cap:
            tile = max(8, (tile // 2 // 8) * 8)
        vmem_limit = int(min(self._vmem_cap, _budget(tile)))

        n_pad = _round_up(N, tile)
        if n_pad != N:
            zpad = ((0, n_pad - N), (0, 0))
            frames = jnp.pad(frames, zpad)
            windows = jnp.pad(windows, zpad)
            lifter = jnp.pad(lifter, zpad)
        grid = n_pad // tile

        kernel = functools.partial(
            _flatten_loss_kernel, power=self.power, l2_norm=self.l2_norm,
            half=fft // 2, ne_pad=self.ne_pad, no_pad=self.no_pad)

        partials = pl.pallas_call(
            kernel,
            out_shape=jax.ShapeDtypeStruct((grid, 8, 128), jnp.float32),
            grid_spec=pltpu.PrefetchScalarGridSpec(
                num_scalar_prefetch=0,
                grid=(grid,),
                in_specs=[
                    pl.BlockSpec((tile, fft), lambda i: (i, 0)),   # frames   (bf16)
                    pl.BlockSpec((tile, fft), lambda i: (i, 0)),   # windows  (bf16)
                    pl.BlockSpec((tile, qb), lambda i: (i, 0)),    # lifter   (bf16)
                    # constants: whole-array resident in VMEM (single buffer, no pipelining)
                    pl.BlockSpec(memory_space=pltpu.MemorySpace.VMEM),  # ce   (even-bin DFT)
                    pl.BlockSpec(memory_space=pltpu.MemorySpace.VMEM),  # co   (odd-bin DFT)
                    pl.BlockSpec(memory_space=pltpu.MemorySpace.VMEM),  # cfe  (fwd cos, even rows)
                    pl.BlockSpec(memory_space=pltpu.MemorySpace.VMEM),  # cfo  (fwd cos, odd rows)
                    pl.BlockSpec(memory_space=pltpu.MemorySpace.VMEM),  # cnat (inv cos transform)
                ],
                out_specs=pl.BlockSpec((1, 8, 128), lambda i: (i, 0, 0)),
            ),
            compiler_params=pltpu.CompilerParams(
                dimension_semantics=("parallel",),
                vmem_limit_bytes=vmem_limit),
        )(frames, windows, lifter, self.ce, self.co, self.cfe, self.cfo, self.cnat)

        total = jnp.sum(partials)
        if self.power:
            # padded lanes of valid rows and all lanes of padded rows contribute exactly
            # exp(0) == 1 each (for both L1 and L2); subtract the exact static count.
            total = total - jnp.float32(N * (qb - bins) + (n_pad - N) * qb)
        return total / jnp.float32(N * bins)


# ----------------------------------------------------------------------------
# Pure-JAX reference (uses jnp.fft) for validation.
# ----------------------------------------------------------------------------
def _reference_forward(mod, s, f):
    frames, windows, lifter, B, Tf = mod._preprocess(s, f)
    wx = frames.astype(jnp.float32) * windows.astype(jnp.float32)
    p = jnp.abs(jnp.fft.rfft(wx, axis=-1)) ** 2
    logp = jnp.log(jnp.maximum(p, 1e-7))
    tmp = jnp.concatenate([logp, logp[..., -2:0:-1]], axis=-1)
    cep = jnp.real(jnp.fft.rfft(tmp, axis=-1))
    lift = cep * lifter[..., :mod.bins].astype(jnp.float32)
    tmp2 = jnp.concatenate([lift, lift[..., -2:0:-1]], axis=-1)
    env = jnp.real(jnp.fft.rfft(tmp2, axis=-1))
    if mod.power:
        env = jnp.exp(env)
    return jnp.mean(env ** 2) if mod.l2_norm else jnp.mean(jnp.abs(env))


if __name__ == "__main__":
    # Small but consistent hyperparameters (fft_size >= 3 * fs / f0_floor must hold).
    sampling_rate, hop_size, fft_size = 8000, 80, 512
    B, Tf = 2, 8
    T = hop_size * Tf

    key = jax.random.PRNGKey(0)
    k1, k2 = jax.random.split(key)
    s = jax.random.normal(k1, (B, 1, T), jnp.float32)
    f = jax.random.uniform(k2, (B, 1, Tf), jnp.float32, 60.0, 340.0)
    f = f.at[:, :, 0].set(0.0)  # exercise the unvoiced-frame branch

    loss_mod = FlattenLoss(sampling_rate=sampling_rate, hop_size=hop_size,
                           fft_size=fft_size, f0_floor=70, f0_ceil=340,
                           power=False, elim_0th=False, l2_norm=False)

    loss = jax.block_until_ready(loss_mod(s, f))
    ref = jax.block_until_ready(_reference_forward(loss_mod, s, f))

    assert np.isfinite(float(loss))
    np.testing.assert_allclose(float(loss), float(ref), rtol=0.15, atol=0.03)
    print("KERNEL_OK")
</pallas_src>

<mosaic_0001>
module attributes {stable_mosaic.version = 11 : i64} {
  func.func @_flatten_loss_kernel(%arg0: i32, %arg1: memref<8x512xbf16, #tpu.memory_space<vmem>>, %arg2: memref<8x512xbf16, #tpu.memory_space<vmem>>, %arg3: memref<8x384xbf16, #tpu.memory_space<vmem>>, %arg4: memref<256x512xbf16, #tpu.memory_space<vmem>>, %arg5: memref<256x256xbf16, #tpu.memory_space<vmem>>, %arg6: memref<256x384xbf16, #tpu.memory_space<vmem>>, %arg7: memref<128x384xbf16, #tpu.memory_space<vmem>>, %arg8: memref<384x384xbf16, #tpu.memory_space<vmem>>, %arg9: memref<1x8x128xf32, #tpu.memory_space<vmem>>) attributes {dimension_semantics = [#tpu.dimension_semantics<parallel>], iteration_bounds = array<i64: 2>, scalar_prefetch = 0 : i64, scratch_operands = 0 : i64, tpu.core_type = #tpu.core_type<tc>, window_params = [{transform_indices = @transform_0, window_bounds = array<i64: 8, 512>}, {transform_indices = @transform_1, window_bounds = array<i64: 8, 512>}, {transform_indices = @transform_2, window_bounds = array<i64: 8, 384>}, {pipeline_mode = #tpu.pipeline_mode<synchronous>, transform_indices = @transform_3, window_bounds = array<i64: 256, 512>}, {pipeline_mode = #tpu.pipeline_mode<synchronous>, transform_indices = @transform_4, window_bounds = array<i64: 256, 256>}, {pipeline_mode = #tpu.pipeline_mode<synchronous>, transform_indices = @transform_5, window_bounds = array<i64: 256, 384>}, {pipeline_mode = #tpu.pipeline_mode<synchronous>, transform_indices = @transform_6, window_bounds = array<i64: 128, 384>}, {pipeline_mode = #tpu.pipeline_mode<synchronous>, transform_indices = @transform_7, window_bounds = array<i64: 384, 384>}, {transform_indices = @transform_8, window_bounds = array<i64: 1, 8, 128>}]} {
    %c0 = arith.constant 0 : index
    %c0_0 = arith.constant 0 : index
    %0 = vector.load %arg1[%c0, %c0_0] : memref<8x512xbf16, #tpu.memory_space<vmem>>, vector<8x512xbf16>
    %1 = arith.extf %0 : vector<8x512xbf16> to vector<8x512xf32>
    %c0_1 = arith.constant 0 : index
    %c0_2 = arith.constant 0 : index
    %2 = vector.load %arg2[%c0_1, %c0_2] : memref<8x512xbf16, #tpu.memory_space<vmem>>, vector<8x512xbf16>
    %3 = arith.extf %2 : vector<8x512xbf16> to vector<8x512xf32>
    %4 = arith.mulf %1, %3 : vector<8x512xf32>
    %5 = vector.extract_strided_slice %4 {offsets = [0, 0], sizes = [8, 256], strides = [1, 1]} : vector<8x512xf32> to vector<8x256xf32>
    %6 = vector.extract_strided_slice %4 {offsets = [0, 256], sizes = [8, 256], strides = [1, 1]} : vector<8x512xf32> to vector<8x256xf32>
    %7 = arith.addf %5, %6 : vector<8x256xf32>
    %8 = arith.truncf %7 : vector<8x256xf32> to vector<8x256xbf16>
    %9 = arith.subf %5, %6 : vector<8x256xf32>
    %10 = arith.truncf %9 : vector<8x256xf32> to vector<8x256xbf16>
    %c0_3 = arith.constant 0 : index
    %c0_4 = arith.constant 0 : index
    %11 = vector.load %arg4[%c0_3, %c0_4] : memref<256x512xbf16, #tpu.memory_space<vmem>>, vector<256x512xbf16>
    %cst = arith.constant dense<0.000000e+00> : vector<8x512xf32>
    %12 = tpu.matmul %8, %11, %cst {dimension_numbers = #tpu.dot_dimension_numbers<[1], [0], [0], [1], [0, 0, 1, 1], [], []>} : vector<8x256xbf16>, vector<256x512xbf16>, vector<8x512xf32> -> vector<8x512xf32>
    %c0_5 = arith.constant 0 : index
    %c0_6 = arith.constant 0 : index
    %13 = vector.load %arg5[%c0_5, %c0_6] : memref<256x256xbf16, #tpu.memory_space<vmem>>, vector<256x256xbf16>
    %cst_7 = arith.constant dense<0.000000e+00> : vector<8x256xf32>
    %14 = tpu.matmul %10, %13, %cst_7 {dimension_numbers = #tpu.dot_dimension_numbers<[1], [0], [0], [1], [0, 0, 1, 1], [], []>} : vector<8x256xbf16>, vector<256x256xbf16>, vector<8x256xf32> -> vector<8x256xf32>
    %15 = vector.extract_strided_slice %12 {offsets = [0, 0], sizes = [8, 256], strides = [1, 1]} : vector<8x512xf32> to vector<8x256xf32>
    %16 = arith.mulf %15, %15 : vector<8x256xf32>
    %17 = vector.extract_strided_slice %12 {offsets = [0, 256], sizes = [8, 256], strides = [1, 1]} : vector<8x512xf32> to vector<8x256xf32>
    %18 = arith.mulf %17, %17 : vector<8x256xf32>
    %19 = arith.addf %16, %18 : vector<8x256xf32>
    %20 = vector.extract_strided_slice %14 {offsets = [0, 0], sizes = [8, 128], strides = [1, 1]} : vector<8x256xf32> to vector<8x128xf32>
    %21 = arith.mulf %20, %20 : vector<8x128xf32>
    %22 = vector.extract_strided_slice %14 {offsets = [0, 128], sizes = [8, 128], strides = [1, 1]} : vector<8x256xf32> to vector<8x128xf32>
    %23 = arith.mulf %22, %22 : vector<8x128xf32>
    %24 = arith.addf %21, %23 : vector<8x128xf32>
    %cst_8 = arith.constant 1.000000e-07 : f32
    %25 = vector.broadcast %cst_8 : f32 to vector<8x256xf32>
    %26 = arith.maximumf %19, %25 : vector<8x256xf32>
    %27 = math.log %26 : vector<8x256xf32>
    %28 = arith.truncf %27 : vector<8x256xf32> to vector<8x256xbf16>
    %cst_9 = arith.constant 1.000000e-07 : f32
    %29 = vector.broadcast %cst_9 : f32 to vector<8x128xf32>
    %30 = arith.maximumf %24, %29 : vector<8x128xf32>
    %31 = math.log %30 : vector<8x128xf32>
    %32 = arith.truncf %31 : vector<8x128xf32> to vector<8x128xbf16>
    %c0_10 = arith.constant 0 : index
    %c0_11 = arith.constant 0 : index
    %33 = vector.load %arg6[%c0_10, %c0_11] : memref<256x384xbf16, #tpu.memory_space<vmem>>, vector<256x384xbf16>
    %cst_12 = arith.constant dense<0.000000e+00> : vector<8x384xf32>
    %34 = tpu.matmul %28, %33, %cst_12 {dimension_numbers = #tpu.dot_dimension_numbers<[1], [0], [0], [1], [0, 0, 1, 1], [], []>} : vector<8x256xbf16>, vector<256x384xbf16>, vector<8x384xf32> -> vector<8x384xf32>
    %c0_13 = arith.constant 0 : index
    %c0_14 = arith.constant 0 : index
    %35 = vector.load %arg7[%c0_13, %c0_14] : memref<128x384xbf16, #tpu.memory_space<vmem>>, vector<128x384xbf16>
    %cst_15 = arith.constant dense<0.000000e+00> : vector<8x384xf32>
    %36 = tpu.matmul %32, %35, %cst_15 {dimension_numbers = #tpu.dot_dimension_numbers<[1], [0], [0], [1], [0, 0, 1, 1], [], []>} : vector<8x128xbf16>, vector<128x384xbf16>, vector<8x384xf32> -> vector<8x384xf32>
    %37 = arith.addf %34, %36 : vector<8x384xf32>
    %c0_16 = arith.constant 0 : index
    %c0_17 = arith.constant 0 : index
    %38 = vector.load %arg3[%c0_16, %c0_17] : memref<8x384xbf16, #tpu.memory_space<vmem>>, vector<8x384xbf16>
    %39 = arith.extf %38 : vector<8x384xbf16> to vector<8x384xf32>
    %40 = arith.mulf %37, %39 : vector<8x384xf32>
    %41 = arith.truncf %40 : vector<8x384xf32> to vector<8x384xbf16>
    %c0_18 = arith.constant 0 : index
    %c0_19 = arith.constant 0 : index
    %42 = vector.load %arg8[%c0_18, %c0_19] : memref<384x384xbf16, #tpu.memory_space<vmem>>, vector<384x384xbf16>
    %cst_20 = arith.constant dense<0.000000e+00> : vector<8x384xf32>
    %43 = tpu.matmul %41, %42, %cst_20 {dimension_numbers = #tpu.dot_dimension_numbers<[1], [0], [0], [1], [0, 0, 1, 1], [], []>} : vector<8x384xbf16>, vector<384x384xbf16>, vector<8x384xf32> -> vector<8x384xf32>
    %44 = math.absf %43 : vector<8x384xf32>
    %45 = vector.shape_cast %44 : vector<8x384xf32> to vector<1x8x3x128xf32>
    %cst_21 = arith.constant dense<0.000000e+00> : vector<8x3x128xf32>
    %46 = vector.multi_reduction <add>, %45, %cst_21 [0] : vector<1x8x3x128xf32> to vector<8x3x128xf32>
    %cst_22 = arith.constant dense<0.000000e+00> : vector<8x128xf32>
    %47 = vector.multi_reduction <add>, %46, %cst_22 [1] : vector<8x3x128xf32> to vector<8x128xf32>
    %c0_23 = arith.constant 0 : index
    %c0_24 = arith.constant 0 : index
    %c0_25 = arith.constant 0 : index
    %48 = vector.load %arg9[%c0_23, %c0_24, %c0_25] : memref<1x8x128xf32, #tpu.memory_space<vmem>>, vector<1x8x128xf32>
    %49 = vector.shape_cast %48 : vector<1x8x128xf32> to vector<8x128xf32>
    %50 = vector.shape_cast %47 : vector<8x128xf32> to vector<1x8x128xf32>
    tpu.vector_store %arg9[%c0_23, %c0_24, %c0_25], %50 {strides = array<i32>} : memref<1x8x128xf32, #tpu.memory_space<vmem>>, vector<1x8x128xf32>,
    return
  }
  func.func @transform_0(%arg0: i32) -> (i32, i32) {
    %c0_i32 = arith.constant 0 : i32
    %c0_i32_0 = arith.constant 0 : i32
    return %arg0, %c0_i32 : i32, i32
  }
  func.func @transform_1(%arg0: i32) -> (i32, i32) {
    %c0_i32 = arith.constant 0 : i32
    %c0_i32_0 = arith.constant 0 : i32
    return %arg0, %c0_i32 : i32, i32
  }
  func.func @transform_2(%arg0: i32) -> (i32, i32) {
    %c0_i32 = arith.constant 0 : i32
    %c0_i32_0 = arith.constant 0 : i32
    return %arg0, %c0_i32 : i32, i32
  }
  func.func @transform_3(%arg0: i32) -> (i32, i32) {
    %c0_i32 = arith.constant 0 : i32
    %c0_i32_0 = arith.constant 0 : i32
    %c0_i32_1 = arith.constant 0 : i32
    return %c0_i32, %c0_i32_0 : i32, i32
  }
  func.func @transform_4(%arg0: i32) -> (i32, i32) {
    %c0_i32 = arith.constant 0 : i32
    %c0_i32_0 = arith.constant 0 : i32
    %c0_i32_1 = arith.constant 0 : i32
    return %c0_i32, %c0_i32_0 : i32, i32
  }
  func.func @transform_5(%arg0: i32) -> (i32, i32) {
    %c0_i32 = arith.constant 0 : i32
    %c0_i32_0 = arith.constant 0 : i32
    %c0_i32_1 = arith.constant 0 : i32
    return %c0_i32, %c0_i32_0 : i32, i32
  }
  func.func @transform_6(%arg0: i32) -> (i32, i32) {
    %c0_i32 = arith.constant 0 : i32
    %c0_i32_0 = arith.constant 0 : i32
    %c0_i32_1 = arith.constant 0 : i32
    return %c0_i32, %c0_i32_0 : i32, i32
  }
  func.func @transform_7(%arg0: i32) -> (i32, i32) {
    %c0_i32 = arith.constant 0 : i32
    %c0_i32_0 = arith.constant 0 : i32
    %c0_i32_1 = arith.constant 0 : i32
    return %c0_i32, %c0_i32_0 : i32, i32
  }
  func.func @transform_8(%arg0: i32) -> (i32, i32, i32) {
    %c0_i32 = arith.constant 0 : i32
    %c0_i32_0 = arith.constant 0 : i32
    %c0_i32_1 = arith.constant 0 : i32
    return %arg0, %c0_i32, %c0_i32_0 : i32, i32, i32
  }
}

</mosaic_0001>

<bundles_post_ra>
// kernel: tpu_custom_call.1
= control target key start
LH: loop header
LB: loop body
LE: loop exit
PB: predicated region body
PF: predicated region fallthrough
CT: control target
= control target key end

     0   :  { %s4382_s0 = inlined_call_operand.hbm [shape: bf16[16,512], index: 0, kind: input, shape index: {}]   ;;  %s4383_s1 = inlined_call_operand.hbm [shape: bf16[16,512], index: 1, kind: input, shape index: {}]   ;;  %s4384_s2 = inlined_call_operand.hbm [shape: bf16[16,384], index: 2, kind: input, shape index: {}]   ;;  %s4385_s3 = inlined_call_operand.hbm [shape: bf16[256,512], index: 3, kind: input, shape index: {}]   ;;  %s4386_s4 = inlined_call_operand.hbm [shape: bf16[256,256], index: 4, kind: input, shape index: {}]   ;;  %s4387_s5 = inlined_call_operand.hbm [shape: bf16[256,384], index: 5, kind: input, shape index: {}]   ;;  %s4388_s6 = inlined_call_operand.hbm [shape: bf16[128,384], index: 6, kind: input, shape index: {}]   ;;  %s4389_s7 = inlined_call_operand.hbm [shape: bf16[384,384], index: 7, kind: input, shape index: {}]   ;;  %s4390_s8 = inlined_call_operand.hbm [shape: f32[2,8,128], index: 8, kind: output, shape index: {}]  }
   0x1   :  { %4411 = sst [smem:[#allocation27_spill]] %s4382_s0 }
   0x2   :  { %4412 = sst [smem:[#allocation28_spill]] %s4383_s1 }
   0x3   :  { %4413 = sst [smem:[#allocation29_spill]] %s4385_s3 }
   0x4   :  { %4414 = sst [smem:[#allocation30_spill]] %s4386_s4 }
   0x5   :  { %4415 = sst [smem:[#allocation31_spill]] %s4387_s5 }
   0x6   :  { %13 = vsyncpa [#allocation3], 0 }
   0x7   :  { %15 = vsyncpa [#allocation3 + $0x1], 0 }
   0x8   :  { %16 = vsyncpa [#allocation6], 0 }
   0x9   :  { %18 = vsyncpa [#allocation6 + $0x1], 0 }
   0xa   :  { %19 = vsyncpa [#allocation9], 0 }
   0xb   :  { %20 = vsyncpa [#allocation12], 0 }
   0xc   :  { %21 = vsyncpa [#allocation15], 0 }
   0xd   :  { %22 = vsyncpa [#allocation4], 0 }
   0xe   :  { %24 = vsyncpa [#allocation4 + $0x1], 0  ;;  %s4038_s27 = smov 0   ;;  %s4040_s28 = smov 0  }
   0xf   :  { %s4042_s29 = smov 0   ;;  %s4044_s30 = smov 0  }
  0x10 LB: > { %4416 = sst [smem:[#allocation23_spill]] %s3967_s29  ;;  %s3973_s9 = smov [#allocation8]   ;;  %s3971_s30 = sphi %s4044_s30, %s4454_s30   ;;  %s3967_s29 = sphi %s4042_s29, %s4456_s29   ;;  %s3963_s28 = sphi %s4040_s28, %s4458_s28   ;;  %s3959_s27 = sphi %s4038_s27, %s4457_s27  }
  0x11   : > { %s256_s10 = sshll.u32 %s3973_s9, 4  ;;  %s4059_s11 = sadd.s32 4294967295, %s3971_s30   ;;  %s257_s10 = int_to_ptr.vmem [resolvable:$true] %s256_s10 }
  0x12   : > { %p2843_p0 = scmp.ge.s32.totalorder %s3971_s30, 1  ;;  %p4391_p1 = scmp.eq.s32.totalorder %s4059_s11, 0 }
  0x13   : > { %p244_p2 = scmp.lt.s32.totalorder %s3971_s30, 3  ;;  %s3974_s13 = smov [#allocation11]  }
  0x14   : > { %s282_s14 = sshll.u32 %s3974_s13, 4  ;;  %s3688_s17 = scalar_lea.vmem %s257_s10, 8192  ;;  %s283_s14 = int_to_ptr.vmem [resolvable:$true] %s282_s14 }
  0x15   : > { %p4064_p3 = pnand %p2843_p0, %p244_p2  ;;  %p3689_p8 = scmp.ne.s32.totalorder %s257_s10, %s3688_s17 }
  0x16   : > { %p3696_p11 = scmp.lt.s32.totalorder %s257_s10, %s257_s10  ;;  %p3697_p12 = scmp.lt.s32.totalorder %s3688_s17, %s3688_s17 }
  0x17   : > { %s4417_s12 = scalar_select %p4064_p3, 1, 0 }
  0x18   : > { %p3245_p5 = pneg %p4064_p3  ;;  %p3698_p13 = por %p3697_p12, %p3696_p11 }
  0x1a   : > { %p4073_p6 = pnand %p3245_p5, %p4391_p1 }
  0x1c   : > { %s4418_s15 = scalar_select %p4073_p6, 1, 0 }
  0x1d   : > { %p4079_p7 = pneg %p4073_p6 }
  0x1f   : > { %s4419_s16 = scalar_select %p4079_p7, 1, 0 }
  0x20   : > { %p3691_p9 = pnand %p3689_p8, %p4079_p7 }
  0x22   : > { %p3692_p10 = pneg %p3691_p9 }
  0x24   : > { %p3699_p0 = pnand %p3698_p13, %p3692_p10 }
  0x26   : > { %3702 = shalt.err (!%p3699_p0)
}
  0x27   : > { %s3975_s18 = smov 256   ;;  %s3976_s19 = smov 16  }
  0x28   : > { %s4420_s3 = sld [smem:[#allocation29_spill]]  ;;  %s3714_s22 = scalar_lea.vmem %s283_s14, 6144 }
  0x29   : > { %p3715_p2 = scmp.ne.s32.totalorder %s283_s14, %s3714_s22  ;;  %p3722_p9 = scmp.lt.s32.totalorder %s283_s14, %s283_s14 }
  0x2a   : > { %p3723_p4 = scmp.lt.s32.totalorder %s3714_s22, %s3714_s22 }
  0x2b   : > { %p3717_p5 = pnand %p3715_p2, %p4079_p7 }
  0x2c   : > { %p3724_p1 = por %p3723_p4, %p3722_p9 }
  0x2d   : > { %p3718_p8 = pneg %p3717_p5 }
  0x2e   : > { %3248 = dma.hbm_to_vmem [thread:$0]  (!%p4073_p6), %s4420_s3, 8192, %s257_s10, [#allocation9], %s3975_s18, %s3975_s18, %s3976_s19  }
  0x2f   : > { %p3725_p11 = pnand %p3724_p1, %p3718_p8 }
  0x31   : > { %3728 = shalt.err (!%p3725_p11)
}
  0x32   : > { %s4393_s23 = smov 192   ;;  %s4395_s24 = smov 12  }
  0x33   : > { %s4421_s5 = sld [smem:[#allocation31_spill]]  ;;  %s2842_s9 = sadd.s32 4294967294, %s3971_s30  }
  0x34   : > { %s4102_s10 = sadd.s32 1, %s3971_s30   ;;  %s37_s17 = sadd.s32 1, %s3967_s29 }
  0x35   : > { %4422 = sst [smem:[#allocation24_spill]] %s4102_s10  ;;  %s34_s13 = ssub.s32 %s3971_s30, %s4102_s10 }
  0x36   : > { %p35_p1 = scmp.eq.s32.totalorder %s34_s13, 0  ;;  %p44_p4 = scmp.ne.s32.totalorder %s3967_s29, %s3963_s28 }
  0x37   : > { %p45_p10 = scmp.eq.s32.totalorder %s3971_s30, 0  ;;  %p50_p12 = scmp.ne.s32.totalorder %s3963_s28, %s3959_s27 }
  0x38   : > { %s4113_s18 = scalar_select %p35_p1, %s3967_s29, %s37_s17  }
  0x39   : > { %3254 = dma.hbm_to_vmem [thread:$0]  (!%p4073_p6), %s4421_s5, 6144, %s283_s14, [#allocation12], %s4393_s23, %s4393_s23, %s4395_s24  }
  0x3a   : > { %4423 = sst [smem:[#allocation25_spill]] %s4113_s18  ;;  %p46_p13 = por %p45_p10, %p44_p4 }
  0x3b   : > { %p4424_p0 = scmp.eq.s32.totalorder %s4059_s11, 0  ;;  %p231_p5 = scmp.eq.s32.totalorder %s4059_s11, 1 }
  0x3c   : > { %p237_p8 = scmp.eq.s32.totalorder %s2842_s9, 1  ;;  %p3280_p9 = scmp.lt.s32.totalorder %s3971_s30, 2 }
  0x3d   : > { %p4117_p2 = por %p4424_p0, %p50_p12  ;;  %s4124_s14 = sand.u32 1, %s3967_s29  }
  0x3e   : > { %p4126_p11 = por %p231_p5, %p44_p4  ;;  %p4130_p3 = por %p237_p8, %p50_p12 }
  0x3f   : > { %s4425_s19 = scalar_select %p4117_p2, 1, 0 }
  0x40   : > { %s4426_s20 = scalar_select %p4126_p11, 1, 0 }
  0x41   : > { %s4427_s21 = scalar_select %p4130_p3, 1, 0 }
  0x42   : > { %s4401_s22 = sshll.u32 %s4124_s14, 4  ;;  %s4402_s25 = sshll.u32 %s3971_s30, 8 }
  0x43   : > { %4428 = sst [smem:[#allocation26_spill]] %s4427_s21  ;;  %p4136_p1 = pnand %p3280_p9, %p46_p13 }
  0x44   : > { %s341_s9 = sand.u32 1, %s3971_s30   ;;  %s4430_s1 = sld [smem:[#allocation28_spill]] }
  0x45   : > { %s345_s24 = scalar_lea.vmem [#allocation5], %s4401_s22  ;;  %s3979_s5 = smov [#allocation10]  }
  0x46   : > { %s353_s3 = sshll.u32 %s345_s24, 4  ;;  %s269_s18 = sshll.u32 %s3979_s5, 4  ;;  %s4150_s3 = int_to_ptr.vmem [resolvable:$true] %s353_s3  ;;  %s270_s18 = int_to_ptr.vmem [resolvable:$true] %s269_s18 }
  0x47   : > { %s4152_s29 = scalar_lea.sflag [#allocation6], %s341_s9  ;;  %p4158_p10 = pneg %p4136_p1 }
  0x49   : > { %s4431_s21 = scalar_select %p4158_p10, 1, 0 }
  0x4a   : > { %s4146_s23 = scalar_lea.hbm %s4430_s1, %s4402_s25  ;;  %s3734_s24 = scalar_lea.hbm %s4430_s1, 512 }
  0x4b   : > { %s3729_s10 = scalar_lea.hbm %s4146_s23, 256  ;;  %p3735_p0 = scmp.lt.s32.totalorder %s4146_s23, %s4430_s1 }
  0x4c   : > { %p3730_p4 = scmp.ne.s32.totalorder %s4146_s23, %s3729_s10  ;;  %p3736_p5 = scmp.lt.s32.totalorder %s3734_s24, %s3729_s10 }
  0x4e   : > { %p3732_p12 = pnand %p4158_p10, %p3730_p4  ;;  %p3737_p8 = por %p3736_p5, %p3735_p0 }
  0x50   : > { %p3733_p13 = pneg %p3732_p12 }
  0x52   : > { %p3738_p9 = pnand %p3737_p8, %p3733_p13 }
  0x54   : > { %3741 = shalt.err (!%p3738_p9)
}
  0x55   : > { %s3742_s5 = scalar_lea.vmem %s4150_s3, 256  ;;  %s3980_s9 = smov [#allocation5]  }
  0x56   : > { %p3743_p3 = scmp.ne.s32.totalorder %s4150_s3, %s3742_s5  ;;  %s3747_s13 = sshll.u32 %s3980_s9, 4  ;;  %s3748_s13 = int_to_ptr.vmem [resolvable:$false] %s3747_s13 }
  0x57   : > { %s3749_s17 = scalar_lea.vmem %s3748_s13, 512  ;;  %p3750_p11 = scmp.lt.s32.totalorder %s4150_s3, %s3748_s13 }
  0x58   : > { %p3745_p4 = pnand %p3743_p3, %p4158_p10  ;;  %p3751_p2 = scmp.lt.s32.totalorder %s3749_s17, %s3742_s5 }
  0x5a   : > { %p3746_p12 = pneg %p3745_p4  ;;  %p3752_p6 = por %p3751_p2, %p3750_p11 }
  0x5c   : > { %p3753_p7 = pnand %p3752_p6, %p3746_p12 }
  0x5e   : > { %3756 = shalt.err (!%p3753_p7)
}
  0x5f   : > { %3267 = dma.hbm_to_vmem [thread:$0]  (!%p4136_p1), %s4146_s23, 256, %s4150_s3, %s4152_s29  }
  0x60   : > { %s3768_s10 = scalar_lea.vmem %s270_s18, 4096  ;;  %p4432_p13 = scmp.ne.s32.totalorder %s4419_s16, 0 }
  0x61   : > { %p3769_p3 = scmp.ne.s32.totalorder %s270_s18, %s3768_s10  ;;  %p3776_p8 = scmp.lt.s32.totalorder %s270_s18, %s270_s18 }
  0x62   : > { %p3777_p9 = scmp.lt.s32.totalorder %s3768_s10, %s3768_s10 }
  0x63   : > { %p3771_p0 = pnand %p3769_p3, %p4432_p13 }
  0x64   : > { %p3778_p4 = por %p3777_p9, %p3776_p8 }
  0x65   : > { %p3772_p5 = pneg %p3771_p0 }
  0x67   : > { %p3779_p10 = pnand %p3778_p4, %p3772_p5 }
  0x69   : > { %3782 = shalt.err (!%p3779_p10)
}
  0x6a   : > { %s3981_s22 = smov 128   ;;  %s3982_s25 = smov 8  }
  0x6b   : > { %p4433_p6 = scmp.ne.s32.totalorder %s4418_s15, 0  ;;  %s4434_s4 = sld [smem:[#allocation30_spill]] }
  0x6c   : > { %s3983_s3 = smov [#allocation13]   ;;  %s3984_s9 = smov [#allocation14]  }
  0x6d   : > { %s295_s23 = sshll.u32 %s3983_s3, 4  ;;  %s308_s13 = sshll.u32 %s3984_s9, 4  ;;  %s296_s23 = int_to_ptr.vmem [resolvable:$true] %s295_s23  ;;  %s309_s13 = int_to_ptr.vmem [resolvable:$true] %s308_s13 }
  0x6e   : > { %s3794_s17 = scalar_lea.vmem %s296_s23, 3072  ;;  %p3802_p10 = scmp.lt.s32.totalorder %s296_s23, %s296_s23 }
  0x6f   : > { %p3795_p7 = scmp.ne.s32.totalorder %s296_s23, %s3794_s17  ;;  %p3803_p12 = scmp.lt.s32.totalorder %s3794_s17, %s3794_s17 }
  0x71   : > { %3251 = dma.hbm_to_vmem [thread:$0]  (!%p4433_p6), %s4434_s4, 4096, %s270_s18, [#allocation9], %s3981_s22, %s3981_s22, %s3982_s25  }
  0x72   : > { %p3797_p2 = pnand %p3795_p7, %p4432_p13  ;;  %p3804_p3 = por %p3803_p12, %p3802_p10 }
  0x74   : > { %p3798_p11 = pneg %p3797_p2 }
  0x76   : > { %p3805_p0 = pnand %p3804_p3, %p3798_p11 }
  0x78   : > { %3808 = shalt.err (!%p3805_p0)
}
  0x79   : > { %s4435_s10 = smov 12   ;;  %s4436_s24 = smov 192  }
  0x7a   : > { %3257 = dma.hbm_to_vmem [thread:$0]  (!%p4433_p6), %s4388_s6, 3072, %s296_s23, [#allocation12], %s4436_s24, %s4436_s24, %s4435_s10  }
  0x7b   : > { %s3820_s25 = scalar_lea.vmem %s309_s13, 9216  ;;  %p3828_p4 = scmp.lt.s32.totalorder %s309_s13, %s309_s13 }
  0x7c   : > { %p3821_p5 = scmp.ne.s32.totalorder %s309_s13, %s3820_s25  ;;  %p3829_p7 = scmp.lt.s32.totalorder %s3820_s25, %s3820_s25 }
  0x7e   : > { %p3823_p8 = pnand %p3821_p5, %p4432_p13  ;;  %p3830_p2 = por %p3829_p7, %p3828_p4 }
  0x80   : > { %p3824_p9 = pneg %p3823_p8 }
  0x82   : > { %p3831_p11 = pnand %p3830_p2, %p3824_p9 }
  0x84   : > { %3834 = shalt.err (!%p3831_p11)
}
  0x85   : > { %3260 = dma.hbm_to_vmem [thread:$0]  (!%p4433_p6), %s4389_s7, 9216, %s309_s13, [#allocation15], %s4436_s24, %s4436_s24, %s4435_s10  }
  0x86   : > { %s4437_s16 = sshll.u32 %s3971_s30, 8  ;;  %s4438_s0 = sld [smem:[#allocation27_spill]] }
  0x87   : > { %s4439_s15 = sshll.u32 %s4124_s14, 4  ;;  %s3215_s5 = smul.u32 192, %s3971_s30 }
  0x88   : > { %s326_s18 = scalar_lea.vmem [#allocation2], %s4439_s15  ;;  %s323_s3 = scalar_lea.sflag [#allocation3], %s4124_s14 }
  0x89   : > { %s334_s22 = sshll.u32 %s326_s18, 4  ;;  %p4440_p10 = scmp.ne.s32.totalorder %s4431_s21, 0  ;;  %s335_s22 = int_to_ptr.vmem [resolvable:$true] %s334_s22 }
  0x8c   : > { %s4213_s17 = scalar_lea.hbm %s4438_s0, %s4437_s16  ;;  %s3840_s24 = scalar_lea.hbm %s4438_s0, 512 }
  0x8d   : > { %s3835_s1 = scalar_lea.hbm %s4213_s17, 256  ;;  %p3841_p3 = scmp.lt.s32.totalorder %s4213_s17, %s4438_s0 }
  0x8e   : > { %p3836_p13 = scmp.ne.s32.totalorder %s4213_s17, %s3835_s1  ;;  %p3842_p0 = scmp.lt.s32.totalorder %s3840_s24, %s3835_s1 }
  0x90   : > { %p3838_p6 = pnand %p3836_p13, %p4440_p10  ;;  %p3843_p5 = por %p3842_p0, %p3841_p3 }
  0x92   : > { %p3839_p12 = pneg %p3838_p6 }
  0x94   : > { %p3844_p8 = pnand %p3843_p5, %p3839_p12 }
  0x96   : > { %3847 = shalt.err (!%p3844_p8)
}
  0x97   : > { %s3848_s9 = scalar_lea.vmem %s335_s22, 256  ;;  %s3985_s15 = smov [#allocation2]  }
  0x98   : > { %p3849_p9 = scmp.ne.s32.totalorder %s335_s22, %s3848_s9  ;;  %s3853_s18 = sshll.u32 %s3985_s15, 4  ;;  %s3854_s18 = int_to_ptr.vmem [resolvable:$false] %s3853_s18 }
  0x99   : > { %s3855_s25 = scalar_lea.vmem %s3854_s18, 512  ;;  %p3856_p2 = scmp.lt.s32.totalorder %s335_s22, %s3854_s18 }
  0x9a   : > { %p3851_p4 = pnand %p3849_p9, %p4440_p10  ;;  %p3857_p11 = scmp.lt.s32.totalorder %s3855_s25, %s3848_s9 }
  0x9c   : > { %p3852_p7 = pneg %p3851_p4  ;;  %p3858_p13 = por %p3857_p11, %p3856_p2 }
  0x9e   : > { %p3859_p6 = pnand %p3858_p13, %p3852_p7 }
  0xa0   : > { %3862 = shalt.err (!%p3859_p6)
}
  0xa1   : > { %3264 = dma.hbm_to_vmem [thread:$0]  (!%p4136_p1), %s4213_s17, 256, %s335_s22, %s323_s3  }
  0xa2   : > { %s370_s10 = scalar_lea.hbm %s4384_s2, %s3215_s5  ;;  %s4441_s24 = smul.u32 12, %s4124_s14 }
  0xa3   : > { %s3863_s15 = scalar_lea.hbm %s370_s10, 192  ;;  %s3868_s18 = scalar_lea.hbm %s4384_s2, 384 }
  0xa4   : > { %s364_s16 = scalar_lea.vmem [#allocation7], %s4441_s24  ;;  %p3864_p12 = scmp.ne.s32.totalorder %s370_s10, %s3863_s15 }
  0xa5   : > { %s372_s23 = sshll.u32 %s364_s16, 4  ;;  %p3869_p5 = scmp.lt.s32.totalorder %s370_s10, %s4384_s2  ;;  %s373_s23 = int_to_ptr.vmem [resolvable:$true] %s372_s23 }
  0xa6   : > { %p3866_p3 = pnand %p3864_p12, %p4440_p10  ;;  %p3870_p8 = scmp.lt.s32.totalorder %s3868_s18, %s3863_s15 }
  0xa8   : > { %p3867_p0 = pneg %p3866_p3  ;;  %p3871_p9 = por %p3870_p8, %p3869_p5 }
  0xaa   : > { %p3872_p4 = pnand %p3871_p9, %p3867_p0 }
  0xac   : > { %3875 = shalt.err (!%p3872_p4)
}
  0xad   : > { %s3876_s14 = scalar_lea.vmem %s373_s23, 192  ;;  %s3986_s17 = smov [#allocation7]  }
  0xae   : > { %p3877_p7 = scmp.ne.s32.totalorder %s373_s23, %s3876_s14  ;;  %s3881_s22 = sshll.u32 %s3986_s17, 4  ;;  %s3882_s22 = int_to_ptr.vmem [resolvable:$false] %s3881_s22 }
  0xaf   : > { %s3883_s5 = scalar_lea.vmem %s3882_s22, 384  ;;  %p3884_p13 = scmp.lt.s32.totalorder %s373_s23, %s3882_s22 }
  0xb0   : > { %p3879_p2 = pnand %p3877_p7, %p4440_p10  ;;  %p3885_p6 = scmp.lt.s32.totalorder %s3883_s5, %s3876_s14 }
  0xb2   : > { %p3880_p11 = pneg %p3879_p2  ;;  %p3886_p12 = por %p3885_p6, %p3884_p13 }
  0xb4   : > { %p3887_p3 = pnand %p3886_p12, %p3880_p11 }
  0xb6   : > { %3890 = shalt.err (!%p3887_p3)
}
  0xb7   : > { %3270 = dma.hbm_to_vmem [thread:$0]  (!%p4136_p1), %s370_s10, 192, %s373_s23, %s4152_s29  }
  0xb8   : > { %p4442_p0 = scmp.ne.s32.totalorder %s4417_s12, 0 }
  0xb9   : > { %s4257_s0 = sand.u32 (!%p4442_p0), 1, %s3963_s28   ;;  %p4443_p10 = scmp.ne.s32.totalorder (!%p4442_p0), %s4425_s19, 0 }
  0xba   : > { %381 = sbr.rel (%p4442_p0) target bundleno = 1096 (0x448), region = 52  ;;  %s2858_s4 = sshll.u32 (!%p4442_p0), %s4257_s0, 4 }
  0xbb   : > { %s384_s21 = scalar_lea.sflag (!%p4442_p0), [#allocation3], %s4257_s0  ;;  %s4261_s3 = scalar_lea.vmem (!%p4442_p0), [#allocation2], %s2858_s4 }
  0xbf   : > { %3934 = dma.done.wait (%p4443_p10), %s384_s21, 256  }
  0xc0   : > { %3936 = vsyncadd (%p4443_p10), %s384_s21, 4294967040  ;;  %s392_s29 = sand.u32 1, %s4059_s11   ;;  %s4268_s26 = scalar_lea.vmem [#allocation5], %s2858_s4 }
  0xc1   : > { %s393_s12 = scalar_lea.sflag [#allocation6], %s392_s29 }
  0xc2   : > { %3938 = dma.done.wait (%p4443_p10), %s393_s12, 448  }
  0xc3   : > { %3940 = vsyncadd (%p4443_p10), %s393_s12, 4294966848  ;;  %s3216_s1 = smul.u32 12, %s4257_s0  ;;  %p4444_p1 = scmp.eq.s32.totalorder %s4059_s11, 0 }
  0xc5   : > { %s4275_s13 = scalar_lea.vmem [#allocation7], %s3216_s1 }
  0xc6   : > { %3942 = dma.done.wait (%p4444_p1), [#allocation9], 12288   ;;  %p4445_p5 = pmov %p4444_p1 }
  0xc7   : > { %p4446_p8 = pmov %p4444_p1 }
  0xc8   : > { %3944 = vsyncadd (%p4445_p5), [#allocation9], 4294955008 }
  0xc9   : > { %3946 = dma.done.wait (%p4446_p8), [#allocation12], 9216   ;;  %p4447_p9 = pmov %p4444_p1 }
  0xca   : > { %p4448_p4 = pmov %p4444_p1 }
  0xcb   : > { %3948 = vsyncadd (%p4447_p9), [#allocation12], 4294958080 }
  0xcc   : > { %3950 = dma.done.wait (%p4448_p4), [#allocation15], 9216   ;;  %p4449_p7 = pmov %p4444_p1 }
  0xcd   : > { %v3335_v0 = vld [vmem:[#allocation8 + $0xe4] ss:$16 sps:$4 sm:$0xff]   ;;  %v3337_v1 = vld [vmem:[#allocation8 + $0xec] ss:$16 sps:$4 sm:$0xff]   ;;  %v3339_v2 = vld [vmem:[#allocation8 + $0xe0] ss:$16 sps:$4 sm:$0xff]  }
  0xce   : > { %3952 = vsyncadd (%p4449_p7), [#allocation15], 4294958080  ;;  %877 = vmatprep.subr.bf16.mxu0 %v3335_v0  ;;  %v3340_v3 = vld [vmem:[#allocation8 + $0xe8] ss:$16 sps:$4 sm:$0xff]   ;;  %918 = vmatprep.subr.bf16.mxu1 %v3337_v1  ;;  %v3341_v4 = vld [vmem:[#allocation8 + $0xc4] ss:$16 sps:$4 sm:$0xff]  }
  0xcf   : > { %878 = vmatpush1.bf16.msra.mxu0 %v3339_v2  ;;  %919 = vmatpush1.bf16.msra.mxu1 %v3340_v3  ;;  %v3343_v5 = vld [vmem:[#allocation8 + $0xcc] ss:$16 sps:$4 sm:$0xff]   ;;  %v3345_v6 = vld [vmem:[#allocation8 + $0xc0] ss:$16 sps:$4 sm:$0xff]   ;;  %v3346_v7 = vld [vmem:[#allocation8 + $0xc8] ss:$16 sps:$4 sm:$0xff]  }
  0xd0   : > { %879 = vmatprep.subr.bf16.mxu0 %v3341_v4  ;;  %920 = vmatprep.subr.bf16.mxu1 %v3343_v5  ;;  %v3347_v8 = vld [vmem:[#allocation8 + $0xa4] ss:$16 sps:$4 sm:$0xff]   ;;  %v3349_v9 = vld [vmem:[#allocation8 + $0xac] ss:$16 sps:$4 sm:$0xff]   ;;  %v3351_v10 = vld [vmem:[#allocation8 + $0xa0] ss:$16 sps:$4 sm:$0xff]  }
  0xd1   : > { %v3352_v11 = vld [vmem:[#allocation8 + $0xa8] ss:$16 sps:$4 sm:$0xff]   ;;  %v3353_v12 = vld [vmem:[#allocation8 + $0x84] ss:$16 sps:$4 sm:$0xff]   ;;  %v3355_v13 = vld [vmem:[#allocation8 + $0x8c] ss:$16 sps:$4 sm:$0xff]  }
  0xd2   : > { %v3357_v14 = vld [vmem:[#allocation8 + $0x80] ss:$16 sps:$4 sm:$0xff]   ;;  %v3358_v15 = vld [vmem:[#allocation8 + $0x88] ss:$16 sps:$4 sm:$0xff]   ;;  %v3359_v16 = vld [vmem:[#allocation8 + $0x64] ss:$16 sps:$4 sm:$0xff]  }
  0xd3   : > { %880 = vmatpush1.bf16.msra.mxu0 %v3345_v6  ;;  %921 = vmatpush1.bf16.msra.mxu1 %v3346_v7  ;;  %v3361_v17 = vld [vmem:[#allocation8 + $0x6c] ss:$16 sps:$4 sm:$0xff]   ;;  %v3363_v18 = vld [vmem:[#allocation8 + $0x60] ss:$16 sps:$4 sm:$0xff]   ;;  %v3364_v19 = vld [vmem:[#allocation8 + $0x68] ss:$16 sps:$4 sm:$0xff]  }
  0xd4   : > { %881 = vmatprep.subr.bf16.mxu0 %v3347_v8  ;;  %922 = vmatprep.subr.bf16.mxu1 %v3349_v9  ;;  %v3365_v20 = vld [vmem:[#allocation8 + $0x44] ss:$16 sps:$4 sm:$0xff]   ;;  %v3367_v21 = vld [vmem:[#allocation8 + $0x4c] ss:$16 sps:$4 sm:$0xff]   ;;  %v3369_v22 = vld [vmem:[#allocation8 + $0x40] ss:$16 sps:$4 sm:$0xff]  }
  0xd5   : > { %v3370_v23 = vld [vmem:[#allocation8 + $0x48] ss:$16 sps:$4 sm:$0xff]   ;;  %v3371_v24 = vld [vmem:[#allocation8 + $0x24] ss:$16 sps:$4 sm:$0xff]   ;;  %v3373_v25 = vld [vmem:[#allocation8 + $0x2c] ss:$16 sps:$4 sm:$0xff]  }
  0xd6   : > { %v3375_v26 = vld [vmem:[#allocation8 + $0x20] ss:$16 sps:$4 sm:$0xff]   ;;  %v3376_v27 = vld [vmem:[#allocation8 + $0x28] ss:$16 sps:$4 sm:$0xff]   ;;  %v3377_v28 = vld [vmem:[#allocation8 + $0x4] ss:$16 sps:$4 sm:$0xff]  }
  0xd7   : > { %882 = vmatpush1.bf16.msra.mxu0 %v3351_v10  ;;  %923 = vmatpush1.bf16.msra.mxu1 %v3352_v11  ;;  %v3379_v29 = vld [vmem:[#allocation8 + $0xc] ss:$16 sps:$4 sm:$0xff]   ;;  %v3381_v30 = vld [vmem:[#allocation8] ss:$16 sps:$4 sm:$0xff]   ;;  %v3382_v31 = vld [vmem:[#allocation8 + $0x8] ss:$16 sps:$4 sm:$0xff]  }
  0xd8   : > { %883 = vmatprep.subr.bf16.mxu0 %v3353_v12  ;;  %924 = vmatprep.subr.bf16.mxu1 %v3355_v13  ;;  %v3383_v32 = vld [vmem:[#allocation8 + $0x1e4] ss:$16 sps:$4 sm:$0xff]   ;;  %v3385_v33 = vld [vmem:[#allocation8 + $0x1ec] ss:$16 sps:$4 sm:$0xff]   ;;  %v3387_v34 = vld [vmem:[#allocation8 + $0x1e0] ss:$16 sps:$4 sm:$0xff]  }
  0xd9   : > { %v3388_v35 = vld [vmem:[#allocation8 + $0x1e8] ss:$16 sps:$4 sm:$0xff]   ;;  %v3389_v36 = vld [vmem:[#allocation8 + $0x1c4] ss:$16 sps:$4 sm:$0xff]   ;;  %v3391_v37 = vld [vmem:[#allocation8 + $0x1cc] ss:$16 sps:$4 sm:$0xff]  }
  0xda   : > { %v3393_v38 = vld [vmem:[#allocation8 + $0x1c0] ss:$16 sps:$4 sm:$0xff]   ;;  %v3394_v39 = vld [vmem:[#allocation8 + $0x1c8] ss:$16 sps:$4 sm:$0xff]   ;;  %v3395_v40 = vld [vmem:[#allocation8 + $0x1a4] ss:$16 sps:$4 sm:$0xff]  }
  0xdb   : > { %884 = vmatpush1.bf16.msra.mxu0 %v3357_v14  ;;  %925 = vmatpush1.bf16.msra.mxu1 %v3358_v15  ;;  %v3397_v41 = vld [vmem:[#allocation8 + $0x1ac] ss:$16 sps:$4 sm:$0xff]   ;;  %v3399_v42 = vld [vmem:[#allocation8 + $0x1a0] ss:$16 sps:$4 sm:$0xff]   ;;  %v3400_v43 = vld [vmem:[#allocation8 + $0x1a8] ss:$16 sps:$4 sm:$0xff]  }
  0xdc   : > { %885 = vmatprep.subr.bf16.mxu0 %v3359_v16  ;;  %926 = vmatprep.subr.bf16.mxu1 %v3361_v17  ;;  %v3401_v44 = vld [vmem:[#allocation8 + $0x184] ss:$16 sps:$4 sm:$0xff]   ;;  %v3403_v45 = vld [vmem:[#allocation8 + $0x18c] ss:$16 sps:$4 sm:$0xff]   ;;  %v3405_v46 = vld [vmem:[#allocation8 + $0x180] ss:$16 sps:$4 sm:$0xff]  }
  0xdd   : > { %v3406_v47 = vld [vmem:[#allocation8 + $0x188] ss:$16 sps:$4 sm:$0xff]   ;;  %v470_v49 = vld [vmem:[%s4261_s3 + $0x8] sm:$0xff]  ;;  %v3409_v59 = vld [vmem:[#allocation8 + $0x16c] ss:$16 sps:$4 sm:$0xff]   ;;  %vm3989_vm0 = vmmov 0  }
  0xde   : > { %v469_v48 = vld [vmem:[%s4261_s3] sm:$0xff]  ;;  %v476_v53 = vld [vmem:[%s4268_s26 + $0x8] sm:$0xff]  ;;  %v473_v55 = vunpack.c.l.bf16 %v470_v49  ;;  %v474_v56 = vunpack.c.h.bf16 %v470_v49  ;;  %vm2586_vm1 = vcmask 1042432   ;;  %s2865_s19 = sshll.u32 %s4257_s0, 3  ;;  %vm2651_vm2 = vcmask 1041409   ;;  %s3107_s10 = sshll.u32 %s4059_s11, 7 }
  0xdf   : > { %886 = vmatpush1.bf16.msra.mxu0 %v3363_v18  ;;  %927 = vmatpush1.bf16.msra.mxu1 %v3364_v19  ;;  %v471_v50 = vunpack.c.l.bf16 %v469_v48  ;;  %v472_v51 = vunpack.c.h.bf16 %v469_v48  ;;  %v475_v52 = vld [vmem:[%s4268_s26] sm:$0xff]  ;;  %v3407_v54 = vld [vmem:[#allocation8 + $0x164] ss:$16 sps:$4 sm:$0xff]   ;;  %v479_v60 = vunpack.c.l.bf16 %v476_v53  ;;  %v480_v61 = vunpack.c.h.bf16 %v476_v53  ;;  %v3411_v63 = vld [vmem:[#allocation8 + $0x160] ss:$16 sps:$4 sm:$0xff]   ;;  %s467_s24 = scalar_lea.vmem [#allocation16], %s2865_s19  ;;  %s4345_s25 = scalar_lea.hbm %s4390_s8, %s3107_s10 }
  0xe0   : > { %887 = vmatprep.subr.bf16.mxu0 %v3365_v20  ;;  %928 = vmatprep.subr.bf16.mxu1 %v3367_v21  ;;  %v477_v57 = vunpack.c.l.bf16 %v475_v52  ;;  %v478_v58 = vunpack.c.h.bf16 %v475_v52  ;;  %v3412_v0 = vld [vmem:[#allocation8 + $0x168] ss:$16 sps:$4 sm:$0xff]   ;;  %v3413_v2 = vld [vmem:[#allocation8 + $0x144] ss:$16 sps:$4 sm:$0xff]   ;;  %v3415_v5 = vld [vmem:[#allocation8 + $0x14c] ss:$16 sps:$4 sm:$0xff]  }
  0xe1   : > { %v484_v1 = vmul.f32 %v480_v61, %v474_v56  ;;  %v483_v4 = vmul.f32 %v479_v60, %v473_v55  ;;  %v3417_v8 = vld [vmem:[#allocation8 + $0x140] ss:$16 sps:$4 sm:$0xff]   ;;  %v3418_v9 = vld [vmem:[#allocation8 + $0x148] ss:$16 sps:$4 sm:$0xff]   ;;  %v3419_v11 = vld [vmem:[#allocation8 + $0x124] ss:$16 sps:$4 sm:$0xff]  }
  0xe2   : > { %v482_v62 = vmul.f32 %v478_v58, %v472_v51  ;;  %v481_v3 = vmul.f32 %v477_v57, %v471_v50  ;;  %v3421_v12 = vld [vmem:[#allocation8 + $0x12c] ss:$16 sps:$4 sm:$0xff]   ;;  %v3423_v13 = vld [vmem:[#allocation8 + $0x120] ss:$16 sps:$4 sm:$0xff]   ;;  %v3424_v14 = vld [vmem:[#allocation8 + $0x128] ss:$16 sps:$4 sm:$0xff]  }
  0xe3   : > { %888 = vmatpush1.bf16.msra.mxu0 %v3369_v22  ;;  %929 = vmatpush1.bf16.msra.mxu1 %v3370_v23  ;;  %v3425_v15 = vld [vmem:[#allocation8 + $0x104] ss:$16 sps:$4 sm:$0xff]   ;;  %v3427_v16 = vld [vmem:[#allocation8 + $0x10c] ss:$16 sps:$4 sm:$0xff]   ;;  %v3429_v17 = vld [vmem:[#allocation8 + $0x100] ss:$16 sps:$4 sm:$0xff]  }
  0xe4   : > { %889 = vmatprep.subr.bf16.mxu0 %v3371_v24  ;;  %930 = vmatprep.subr.bf16.mxu1 %v3373_v25  ;;  %v486_v6 = vadd.f32 %v484_v1, %v482_v62  ;;  %v4293_v7 = vsub.f32 %v481_v3, %v483_v4  ;;  %v485_v18 = vadd.f32 %v483_v4, %v481_v3  ;;  %v3430_v19 = vld [vmem:[#allocation8 + $0x108] ss:$16 sps:$4 sm:$0xff]   ;;  %v3433_v21 = vld [vmem:[#allocation10 + $0x74] ss:$8 sps:$4 sm:$0xff]   ;;  %v3436_v25 = vld [vmem:[#allocation10 + $0x64] ss:$8 sps:$4 sm:$0xff]  }
  0xe5   : > { %v490_v20 = vsub.f32 %v482_v62, %v484_v1  ;;  %v3431_v23 = vld [vmem:[#allocation10 + $0x70] ss:$8 sps:$4 sm:$0xff]   ;;  %v3472_v49 = vld [vmem:[#allocation10 + $0xa4] ss:$8 sps:$4 sm:$0xff]   ;;  %v3470_v50 = vld [vmem:[#allocation10 + $0xa0] ss:$8 sps:$4 sm:$0xff]  }
  0xe6   : > { %v488_v10 = vpack.c.bf16 %v486_v6, %v486_v6  ;;  %v487_v22 = vpack.c.bf16 %v485_v18, %v485_v18  ;;  %v3467_v48 = vld [vmem:[#allocation10 + $0xb0] ss:$8 sps:$4 sm:$0xff]   ;;  %v3475_v51 = vld [vmem:[#allocation10 + $0x94] ss:$8 sps:$4 sm:$0xff]   ;;  %v3478_v53 = vld [vmem:[#allocation10 + $0x84] ss:$8 sps:$4 sm:$0xff]   ;;  %v491_v57 = vpack.c.bf16 %v4293_v7, %v4293_v7 }
  0xe7   : > { %890 = vmatpush1.bf16.msra.mxu0 %v3375_v26  ;;  %931 = vmatpush1.bf16.msra.mxu1 %v3376_v27  ;;  %v492_v24 = vpack.c.bf16 %v490_v20, %v490_v20  ;;  %v3434_v26 = vld [vmem:[#allocation10 + $0x60] ss:$8 sps:$4 sm:$0xff]   ;;  %v3439_v27 = vld [vmem:[#allocation10 + $0x54] ss:$8 sps:$4 sm:$0xff]   ;;  %v3473_v52 = vld [vmem:[#allocation10 + $0x90] ss:$8 sps:$4 sm:$0xff]  }
  0xe8   : > { %891 = vmatprep.subr.bf16.mxu0 %v3377_v28  ;;  %932 = vmatprep.subr.bf16.mxu1 %v3379_v29  ;;  %v3437_v28 = vld [vmem:[#allocation10 + $0x50] ss:$8 sps:$4 sm:$0xff]   ;;  %v3442_v29 = vld [vmem:[#allocation10 + $0x44] ss:$8 sps:$4 sm:$0xff]   ;;  %v3479_v56 = vld [vmem:[#allocation11 + $0xa8] ss:$12 sps:$4 sm:$0xff]  }
  0xe9   : > { %909 = vmatprep.mubr.bf16.mxu0 %v488_v10  ;;  %950 = vmatprep.mubr.bf16.mxu1 %v488_v10  ;;  %v3481_v55 = vld [vmem:[#allocation11 + $0xac] ss:$12 sps:$4 sm:$0xff]   ;;  %v3484_v58 = vld [vmem:[#allocation11 + $0x94] ss:$12 sps:$4 sm:$0xff]   ;;  %v3487_v60 = vld [vmem:[#allocation11 + $0x7c] ss:$12 sps:$4 sm:$0xff]  }
  0xea   : > { %v3485_v61 = vld [vmem:[#allocation11 + $0x78] ss:$12 sps:$4 sm:$0xff]   ;;  %v3491_v1 = vld [vmem:[#allocation11 + $0x48] ss:$12 sps:$4 sm:$0xff]   ;;  %v3494_v3 = vld [vmem:[#allocation11 + $0x30] ss:$12 sps:$4 sm:$0xff]  }
  0xeb   : > { %892 = vmatpush1.bf16.msra.mxu0 %v3381_v30  ;;  %933 = vmatpush1.bf16.msra.mxu1 %v3382_v31  ;;  %v3440_v30 = vld [vmem:[#allocation10 + $0x40] ss:$8 sps:$4 sm:$0xff]   ;;  %v3445_v31 = vld [vmem:[#allocation10 + $0x34] ss:$8 sps:$4 sm:$0xff]   ;;  %v3490_v62 = vld [vmem:[#allocation11 + $0x64] ss:$12 sps:$4 sm:$0xff]  }
  0xec   : > { %893 = vmatprep.subr.bf16.mxu0 %v3383_v32  ;;  %934 = vmatprep.subr.bf16.mxu1 %v3385_v33  ;;  %v3443_v32 = vld [vmem:[#allocation10 + $0x30] ss:$8 sps:$4 sm:$0xff]   ;;  %v3448_v33 = vld [vmem:[#allocation10 + $0x24] ss:$8 sps:$4 sm:$0xff]   ;;  %v3499_v4 = vld [vmem:[#allocation11 + $0x1c] ss:$12 sps:$4 sm:$0xff]  }
  0xed   : > { %v3502_v6 = vld [vmem:[#allocation11 + $0x4] ss:$12 sps:$4 sm:$0xff]   ;;  %v3500_v7 = vld [vmem:[#allocation11] ss:$12 sps:$4 sm:$0xff]   ;;  %vm2653_vm3 = vcmask 1042434   ;;  %vm2655_vm4 = vcmask 1043459  }
  0xee   : > { %v3529_v10 = vld [vmem:[#allocation13 + $0xac] ss:$12 sps:$4 sm:$0xff]   ;;  %v3514_v18 = vld [vmem:[#allocation11 + $0x124] ss:$12 sps:$4 sm:$0xff]   ;;  %vm2657_vm5 = vcmask 1044484   ;;  %vm2659_vm6 = vcmask 1045509  }
  0xef   : > { %894 = vmatpush2.bf16.msra.mxu0 %v3387_v34  ;;  %935 = vmatpush2.bf16.msra.mxu1 %v3388_v35  ;;  %v3446_v34 = vld [vmem:[#allocation10 + $0x20] ss:$8 sps:$4 sm:$0xff]   ;;  %v3451_v35 = vld [vmem:[#allocation10 + $0x14] ss:$8 sps:$4 sm:$0xff]   ;;  %v3517_v20 = vld [vmem:[#allocation11 + $0x10c] ss:$12 sps:$4 sm:$0xff]  }
  0xf0   : > { %895 = vmatprep.subr.bf16.mxu0 %v3389_v36  ;;  %936 = vmatprep.subr.bf16.mxu1 %v3391_v37  ;;  %v3449_v36 = vld [vmem:[#allocation10 + $0x10] ss:$8 sps:$4 sm:$0xff]   ;;  %v3454_v37 = vld [vmem:[#allocation10 + $0x4] ss:$8 sps:$4 sm:$0xff]   ;;  %vm2661_vm7 = vcmask 1046534   ;;  %s2681_s16 = sshll.u32 %s467_s24, 4  ;;  %s2682_s16 = int_to_ptr.vmem [resolvable:$true] %s2681_s16 }
  0xf1   : > { %vm2663_vm8 = vcmask 1047559   ;;  %s2668_s9 = scalar_lea.sflag [#allocation4], %s4257_s0  ;;  %s3891_s18 = scalar_lea.vmem %s2682_s16, 128 }
  0xf2   : > { %p3892_p2 = scmp.ne.s32.totalorder %s2682_s16, %s3891_s18  ;;  %p4450_p11 = scmp.ne.s32.totalorder %s4426_s20, 0 }
  0xf3   : > { %896 = vmatpush2.bf16.msra.mxu0 %v3393_v38  ;;  %937 = vmatpush2.bf16.msra.mxu1 %v3394_v39  ;;  %v3452_v38 = vld [vmem:[#allocation10] ss:$8 sps:$4 sm:$0xff]   ;;  %v3457_v39 = vld [vmem:[#allocation10 + $0xf4] ss:$8 sps:$4 sm:$0xff]   ;;  %s3992_s11 = smov [#allocation16]  }
  0xf4   : > { %897 = vmatprep.subr.bf16.mxu0 %v3395_v40  ;;  %938 = vmatprep.subr.bf16.mxu1 %v3397_v41  ;;  %v3455_v40 = vld [vmem:[#allocation10 + $0xf0] ss:$8 sps:$4 sm:$0xff]   ;;  %v3460_v41 = vld [vmem:[#allocation10 + $0xe4] ss:$8 sps:$4 sm:$0xff]   ;;  %p3893_p13 = pnand %p3892_p2, %p4450_p11  ;;  %s3895_s14 = sshll.u32 %s3992_s11, 4  ;;  %s3896_s14 = int_to_ptr.vmem [resolvable:$false] %s3895_s14 }
  0xf5   : > { %s3897_s17 = scalar_lea.vmem %s3896_s14, 256  ;;  %p3898_p12 = scmp.lt.s32.totalorder %s2682_s16, %s3896_s14 }
  0xf6   : > { %p3894_p6 = pneg %p3893_p13  ;;  %p3899_p3 = scmp.lt.s32.totalorder %s3897_s17, %s3891_s18 }
  0xf7   : > { %898 = vmatpush2.bf16.msra.mxu0 %v3399_v42  ;;  %939 = vmatpush2.bf16.msra.mxu1 %v3400_v43  ;;  %v3458_v42 = vld [vmem:[#allocation10 + $0xe0] ss:$8 sps:$4 sm:$0xff]   ;;  %v3463_v43 = vld [vmem:[#allocation10 + $0xd4] ss:$8 sps:$4 sm:$0xff]  }
  0xf8   : > { %899 = vmatprep.subr.bf16.mxu0 %v3401_v44  ;;  %940 = vmatprep.subr.bf16.mxu1 %v3403_v45  ;;  %v3461_v44 = vld [vmem:[#allocation10 + $0xd0] ss:$8 sps:$4 sm:$0xff]   ;;  %v3466_v45 = vld [vmem:[#allocation10 + $0xc4] ss:$8 sps:$4 sm:$0xff]   ;;  %p3900_p0 = por %p3899_p3, %p3898_p12 }
  0xfa   : > { %p3901_p10 = pnand %p3900_p0, %p3894_p6 }
  0xfb   : > { %900 = vmatpush2.bf16.msra.mxu0 %v3405_v46  ;;  %941 = vmatpush2.bf16.msra.mxu1 %v3406_v47  ;;  %v3464_v46 = vld [vmem:[#allocation10 + $0xc0] ss:$8 sps:$4 sm:$0xff]   ;;  %v3469_v47 = vld [vmem:[#allocation10 + $0xb4] ss:$8 sps:$4 sm:$0xff]  }
  0xfc   : > { %901 = vmatprep.subr.bf16.mxu0 %v3407_v54  ;;  %942 = vmatprep.subr.bf16.mxu1 %v3409_v59  ;;  %v3476_v54 = vld [vmem:[#allocation10 + $0x80] ss:$8 sps:$4 sm:$0xff]   ;;  %v3482_v59 = vld [vmem:[#allocation11 + $0x90] ss:$12 sps:$4 sm:$0xff]  }
  0xff   : > { %902 = vmatpush2.bf16.msra.mxu0 %v3411_v63  ;;  %943 = vmatpush2.bf16.msra.mxu1 %v3412_v0  ;;  %v3488_v63 = vld [vmem:[#allocation11 + $0x60] ss:$12 sps:$4 sm:$0xff]  }
 0x100   : > { %903 = vmatprep.subr.bf16.mxu0 %v3413_v2  ;;  %944 = vmatprep.subr.bf16.mxu1 %v3415_v5  ;;  %v3493_v0 = vld [vmem:[#allocation11 + $0x4c] ss:$12 sps:$4 sm:$0xff]   ;;  %v3496_v2 = vld [vmem:[#allocation11 + $0x34] ss:$12 sps:$4 sm:$0xff]  }
 0x101   : > { %v3497_v5 = vld [vmem:[#allocation11 + $0x18] ss:$12 sps:$4 sm:$0xff]  }
 0x103   : > { %904 = vmatpush2.bf16.msra.mxu0 %v3417_v8  ;;  %945 = vmatpush2.bf16.msra.mxu1 %v3418_v9  ;;  %v3505_v8 = vld [vmem:[#allocation11 + $0x16c] ss:$12 sps:$4 sm:$0xff]   ;;  %v3527_v9 = vld [vmem:[#allocation13 + $0xa8] ss:$12 sps:$4 sm:$0xff]  }
 0x104   : > { %905 = vmatprep.subr.bf16.mxu0 %v3419_v11  ;;  %946 = vmatprep.subr.bf16.mxu1 %v3421_v12  ;;  %v3503_v11 = vld [vmem:[#allocation11 + $0x168] ss:$12 sps:$4 sm:$0xff]  }
 0x105   : > { %v3532_v12 = vld [vmem:[#allocation13 + $0x94] ss:$12 sps:$4 sm:$0xff]  }
 0x107   : > { %906 = vmatpush2.bf16.msra.mxu0 %v3423_v13  ;;  %947 = vmatpush2.bf16.msra.mxu1 %v3424_v14  ;;  %v3508_v13 = vld [vmem:[#allocation11 + $0x154] ss:$12 sps:$4 sm:$0xff]   ;;  %v3530_v14 = vld [vmem:[#allocation13 + $0x90] ss:$12 sps:$4 sm:$0xff]  }
 0x108   : > { %907 = vmatprep.subr.bf16.mxu0 %v3425_v15  ;;  %948 = vmatprep.subr.bf16.mxu1 %v3427_v16  ;;  %v3506_v15 = vld [vmem:[#allocation11 + $0x150] ss:$12 sps:$4 sm:$0xff]  }
 0x109   : > { %v3511_v16 = vld [vmem:[#allocation11 + $0x13c] ss:$12 sps:$4 sm:$0xff]  }
 0x10b   : > { %908 = vmatpush2.bf16.msra.mxu0 %v3429_v17  ;;  %949 = vmatpush2.bf16.msra.mxu1 %v3430_v19  ;;  %v3509_v17 = vld [vmem:[#allocation11 + $0x138] ss:$12 sps:$4 sm:$0xff]   ;;  %v3512_v19 = vld [vmem:[#allocation11 + $0x120] ss:$12 sps:$4 sm:$0xff]  }
 0x10c   : > { %1151 = vmatprep.subr.bf16.mxu0 %v3433_v21  ;;  %1437 = vmatprep.subr.bf16.mxu1 %v3529_v10  ;;  %v3515_v21 = vld [vmem:[#allocation11 + $0x108] ss:$12 sps:$4 sm:$0xff]   ;;  %v3551_v10 = vld [vmem:[#allocation13 + $0xb0] ss:$12 sps:$4 sm:$0xff]  }
 0x10e   : > { %910 = vmatmul.mubr.bf16.vlgmr.msra.gmra.mxu0 %v487_v22  ;;  %951 = vmatmul.mubr.bf16.vlgmr.msra.gmra.mxu1 %v487_v22  ;;  %v3520_v22 = vld [vmem:[#allocation11 + $0xf4] ss:$12 sps:$4 sm:$0xff]  }
 0x10f   : > { %1152 = vmatpush1.bf16.msra.mxu0 %v3431_v23  ;;  %1183 = vmatprep.mubr.bf16.mxu0 %v492_v24  ;;  %v3518_v23 = vld [vmem:[#allocation11 + $0xf0] ss:$12 sps:$4 sm:$0xff]  }
 0x110   : > { %1153 = vmatprep.subr.bf16.mxu0 %v3436_v25  ;;  %1438 = vmatpush1.bf16.msra.mxu1 %v3527_v9  ;;  %v3523_v24 = vld [vmem:[#allocation11 + $0xdc] ss:$12 sps:$4 sm:$0xff]   ;;  %v3521_v25 = vld [vmem:[#allocation11 + $0xd8] ss:$12 sps:$4 sm:$0xff]  }
 0x111   : > { %1439 = vmatprep.subr.bf16.mxu1 %v3532_v12  ;;  %v3552_v12 = vld [vmem:[#allocation13 + $0x98] ss:$12 sps:$4 sm:$0xff]  }
 0x113   : > { %1154 = vmatpush1.bf16.msra.mxu0 %v3434_v26  ;;  %v3526_v26 = vld [vmem:[#allocation11 + $0xc4] ss:$12 sps:$4 sm:$0xff]  }
 0x114   : > { %1155 = vmatprep.subr.bf16.mxu0 %v3439_v27  ;;  %1440 = vmatpush1.bf16.msra.mxu1 %v3530_v14  ;;  %v3524_v27 = vld [vmem:[#allocation11 + $0xc0] ss:$12 sps:$4 sm:$0xff]   ;;  %v3554_v14 = vld [vmem:[#allocation13 + $0x68] ss:$12 sps:$4 sm:$0xff]  }
 0x117   : > { %1156 = vmatpush1.bf16.msra.mxu0 %v3437_v28  ;;  %v3535_v28 = vld [vmem:[#allocation13 + $0x7c] ss:$12 sps:$4 sm:$0xff]  }
 0x118   : > { %1157 = vmatprep.subr.bf16.mxu0 %v3442_v29  ;;  %v3533_v29 = vld [vmem:[#allocation13 + $0x78] ss:$12 sps:$4 sm:$0xff]   ;;  %1441 = vmatprep.subr.bf16.mxu1 %v3535_v28  ;;  %v3568_v28 = vld [vmem:[#allocation11 + $0x50] ss:$12 sps:$4 sm:$0xff]  }
 0x119   : > { %1442 = vmatpush1.bf16.msra.mxu1 %v3533_v29  ;;  %v3569_v29 = vld [vmem:[#allocation11 + $0xf8] ss:$12 sps:$4 sm:$0xff]  }
 0x11b   : > { %1158 = vmatpush1.bf16.msra.mxu0 %v3440_v30  ;;  %v3538_v30 = vld [vmem:[#allocation13 + $0x64] ss:$12 sps:$4 sm:$0xff]  }
 0x11c   : > { %1159 = vmatprep.subr.bf16.mxu0 %v3445_v31  ;;  %v3536_v31 = vld [vmem:[#allocation13 + $0x60] ss:$12 sps:$4 sm:$0xff]   ;;  %1443 = vmatprep.subr.bf16.mxu1 %v3538_v30  ;;  %v3570_v30 = vld [vmem:[#allocation11 + $0x38] ss:$12 sps:$4 sm:$0xff]  }
 0x11d   : > { %1444 = vmatpush1.bf16.msra.mxu1 %v3536_v31  ;;  %v3571_v31 = vld [vmem:[#allocation11 + $0xe0] ss:$12 sps:$4 sm:$0xff]  }
 0x11f   : > { %1160 = vmatpush1.bf16.msra.mxu0 %v3443_v32  ;;  %v3541_v32 = vld [vmem:[#allocation13 + $0x4c] ss:$12 sps:$4 sm:$0xff]  }
 0x120   : > { %1161 = vmatprep.subr.bf16.mxu0 %v3448_v33  ;;  %v3539_v33 = vld [vmem:[#allocation13 + $0x48] ss:$12 sps:$4 sm:$0xff]   ;;  %1445 = vmatprep.subr.bf16.mxu1 %v3541_v32  ;;  %v3572_v32 = vld [vmem:[#allocation11 + $0x20] ss:$12 sps:$4 sm:$0xff]  }
 0x121   : > { %1446 = vmatpush1.bf16.msra.mxu1 %v3539_v33  ;;  %v3573_v33 = vld [vmem:[#allocation11 + $0xc8] ss:$12 sps:$4 sm:$0xff]  }
 0x123   : > { %1162 = vmatpush1.bf16.msra.mxu0 %v3446_v34  ;;  %v3544_v34 = vld [vmem:[#allocation13 + $0x34] ss:$12 sps:$4 sm:$0xff]  }
 0x124   : > { %1163 = vmatprep.subr.bf16.mxu0 %v3451_v35  ;;  %v3542_v35 = vld [vmem:[#allocation13 + $0x30] ss:$12 sps:$4 sm:$0xff]   ;;  %1447 = vmatprep.subr.bf16.mxu1 %v3544_v34  ;;  %v3574_v34 = vld [vmem:[#allocation11 + $0x8] ss:$12 sps:$4 sm:$0xff]  }
 0x125   : > { %1448 = vmatpush1.bf16.msra.mxu1 %v3542_v35  ;;  %v3577_v35 = vld [vmem:[#allocation14 + $0xac] ss:$12 sps:$4 sm:$0xff]  }
 0x127   : > { %1164 = vmatpush1.bf16.msra.mxu0 %v3449_v36  ;;  %v3547_v36 = vld [vmem:[#allocation13 + $0x1c] ss:$12 sps:$4 sm:$0xff]  }
 0x128   : > { %1165 = vmatprep.subr.bf16.mxu0 %v3454_v37  ;;  %v3545_v37 = vld [vmem:[#allocation13 + $0x18] ss:$12 sps:$4 sm:$0xff]   ;;  %1449 = vmatprep.subr.bf16.mxu1 %v3547_v36  ;;  %v3575_v36 = vld [vmem:[#allocation14 + $0xa8] ss:$12 sps:$4 sm:$0xff]  }
 0x129   : > { %1450 = vmatpush1.bf16.msra.mxu1 %v3545_v37  ;;  %v3580_v37 = vld [vmem:[#allocation14 + $0x94] ss:$12 sps:$4 sm:$0xff]  }
 0x12b   : > { %1166 = vmatpush1.bf16.msra.mxu0 %v3452_v38  ;;  %v3550_v38 = vld [vmem:[#allocation13 + $0x4] ss:$12 sps:$4 sm:$0xff]  }
 0x12c   : > { %1167 = vmatprep.subr.bf16.mxu0 %v3457_v39  ;;  %v3548_v39 = vld [vmem:[#allocation13] ss:$12 sps:$4 sm:$0xff]   ;;  %1451 = vmatprep.subr.bf16.mxu1 %v3550_v38  ;;  %v3578_v38 = vld [vmem:[#allocation14 + $0x90] ss:$12 sps:$4 sm:$0xff]  }
 0x12d   : > { %1452 = vmatpush1.bf16.msra.mxu1 %v3548_v39  ;;  %v3583_v39 = vld [vmem:[#allocation14 + $0x7c] ss:$12 sps:$4 sm:$0xff]  }
 0x12f   : > { %1168 = vmatpush2.bf16.msra.mxu0 %v3455_v40  ;;  %v3987_v40 = vmov 0  }
 0x130   : > { %1169 = vmatprep.subr.bf16.mxu0 %v3460_v41  ;;  %1469 = vmatprep.mubr.bf16.mxu1 %v3987_v40  ;;  %v3988_v41 = vmov 0.0  }
 0x131   : > { %3174 = vmatprep.subr.bf16.mxu1 %v3988_v41 }
 0x133   : > { %1170 = vmatpush2.bf16.msra.mxu0 %v3458_v42 }
 0x134   : > { %1171 = vmatprep.subr.bf16.mxu0 %v3463_v43 }
 0x137   : > { %1172 = vmatpush2.bf16.msra.mxu0 %v3461_v44 }
 0x138   : > { %1173 = vmatprep.subr.bf16.mxu0 %v3466_v45 }
 0x13b   : > { %1174 = vmatpush2.bf16.msra.mxu0 %v3464_v46 }
 0x13c   : > { %1175 = vmatprep.subr.bf16.mxu0 %v3469_v47 }
 0x13f   : > { %1176 = vmatpush2.bf16.msra.mxu0 %v3467_v48 }
 0x140   : > { %1177 = vmatprep.subr.bf16.mxu0 %v3472_v49 }
 0x143   : > { %1178 = vmatpush2.bf16.msra.mxu0 %v3470_v50 }
 0x144   : > { %1179 = vmatprep.subr.bf16.mxu0 %v3475_v51 }
 0x147   : > { %1180 = vmatpush2.bf16.msra.mxu0 %v3473_v52 }
 0x148   : > { %1181 = vmatprep.subr.bf16.mxu0 %v3478_v53 }
 0x14b   : > { %1182 = vmatpush2.bf16.msra.mxu0 %v3476_v54 }
 0x14c   : > { %1774 = vmatprep.subr.bf16.mxu0 %v3481_v55 }
 0x14e   : > { %1184 = vmatmul.mubr.bf16.vlgmr.msra.gmra.mxu0 %v491_v57 }
 0x14f   : > { %1775 = vmatpush1.bf16.msra.mxu0 %v3479_v56 }
 0x150   : > { %1776 = vmatprep.subr.bf16.mxu0 %v3484_v58 }
 0x153   : > { %1777 = vmatpush1.bf16.msra.mxu0 %v3482_v59 }
 0x154   : > { %1778 = vmatprep.subr.bf16.mxu0 %v3487_v60 }
 0x157   : > { %1779 = vmatpush1.bf16.msra.mxu0 %v3485_v61 }
 0x158   : > { %1780 = vmatprep.subr.bf16.mxu0 %v3490_v62 }
 0x15b   : > { %1781 = vmatpush1.bf16.msra.mxu0 %v3488_v63 }
 0x15c   : > { %1782 = vmatprep.subr.bf16.mxu0 %v3493_v0 }
 0x15f   : > { %1783 = vmatpush1.bf16.msra.mxu0 %v3491_v1 }
 0x160   : > { %1784 = vmatprep.subr.bf16.mxu0 %v3496_v2 }
 0x163   : > { %1785 = vmatpush1.bf16.msra.mxu0 %v3494_v3 }
 0x164   : > { %1786 = vmatprep.subr.bf16.mxu0 %v3499_v4 }
 0x167   : > { %1787 = vmatpush1.bf16.msra.mxu0 %v3497_v5 }
 0x168   : > { %1788 = vmatprep.subr.bf16.mxu0 %v3502_v6 }
 0x16b   : > { %1789 = vmatpush1.bf16.msra.mxu0 %v3500_v7 }
 0x16c   : > { %1790 = vmatprep.subr.bf16.mxu0 %v3505_v8 }
 0x16f   : > { %1791 = vmatpush2.bf16.msra.mxu0 %v3503_v11 }
 0x170   : > { %1792 = vmatprep.subr.bf16.mxu0 %v3508_v13  ;;  %v3553_v13 = vld [vmem:[#allocation13 + $0x80] ss:$12 sps:$4 sm:$0xff]  }
 0x173   : > { %1793 = vmatpush2.bf16.msra.mxu0 %v3506_v15  ;;  %v3555_v15 = vld [vmem:[#allocation13 + $0x50] ss:$12 sps:$4 sm:$0xff]  }
 0x174   : > { %1794 = vmatprep.subr.bf16.mxu0 %v3511_v16  ;;  %v3556_v16 = vld [vmem:[#allocation13 + $0x38] ss:$12 sps:$4 sm:$0xff]  }
 0x177   : > { %1795 = vmatpush2.bf16.msra.mxu0 %v3509_v17  ;;  %v3557_v17 = vld [vmem:[#allocation13 + $0x20] ss:$12 sps:$4 sm:$0xff]  }
 0x178   : > { %1796 = vmatprep.subr.bf16.mxu0 %v3514_v18  ;;  %v3558_v18 = vld [vmem:[#allocation13 + $0x8] ss:$12 sps:$4 sm:$0xff]  }
 0x17b   : > { %1797 = vmatpush2.bf16.msra.mxu0 %v3512_v19  ;;  %v3559_v19 = vld [vmem:[#allocation11 + $0x170] ss:$12 sps:$4 sm:$0xff]  }
 0x17c   : > { %1798 = vmatprep.subr.bf16.mxu0 %v3517_v20  ;;  %v3560_v20 = vld [vmem:[#allocation11 + $0xb0] ss:$12 sps:$4 sm:$0xff]  }
 0x17f   : > { %1799 = vmatpush2.bf16.msra.mxu0 %v3515_v21  ;;  %v3561_v21 = vld [vmem:[#allocation11 + $0x158] ss:$12 sps:$4 sm:$0xff]  }
 0x180   : > { %1800 = vmatprep.subr.bf16.mxu0 %v3520_v22  ;;  %v3562_v22 = vld [vmem:[#allocation11 + $0x98] ss:$12 sps:$4 sm:$0xff]  }
 0x183   : > { %1801 = vmatpush2.bf16.msra.mxu0 %v3518_v23  ;;  %v3563_v23 = vld [vmem:[#allocation11 + $0x140] ss:$12 sps:$4 sm:$0xff]  }
 0x184   : > { %1802 = vmatprep.subr.bf16.mxu0 %v3523_v24  ;;  %v3564_v24 = vld [vmem:[#allocation11 + $0x80] ss:$12 sps:$4 sm:$0xff]  }
 0x187   : > { %1803 = vmatpush2.bf16.msra.mxu0 %v3521_v25  ;;  %v3565_v25 = vld [vmem:[#allocation11 + $0x128] ss:$12 sps:$4 sm:$0xff]  }
 0x188   : > { %1804 = vmatprep.subr.bf16.mxu0 %v3526_v26  ;;  %v3566_v26 = vld [vmem:[#allocation11 + $0x68] ss:$12 sps:$4 sm:$0xff]  }
 0x18b   : > { %1805 = vmatpush2.bf16.msra.mxu0 %v3524_v27  ;;  %v3567_v27 = vld [vmem:[#allocation11 + $0x110] ss:$12 sps:$4 sm:$0xff]  }
 0x1ce   : > { %v911_v42 = vpop.f32.mrf.mxu0  ;;  %v952_v43 = vpop.f32.mrf.mxu1 }
 0x1cf   : > { %v1192_v44 = vmul.f32 %v911_v42, %v911_v42  ;;  %v1194_v45 = vmul.f32 %v952_v43, %v952_v43  ;;  %v3586_v42 = vld [vmem:[#allocation14 + $0x64] ss:$12 sps:$4 sm:$0xff]   ;;  %v3584_v43 = vld [vmem:[#allocation14 + $0x60] ss:$12 sps:$4 sm:$0xff]  }
 0x1d0   : > { %v913_v46 = vpop.f32.mrf.mxu0  ;;  %v954_v47 = vpop.f32.mrf.mxu1 }
 0x1d1   : > { %v1196_v48 = vadd.f32 %v1194_v45, %v1192_v44  ;;  %v1193_v49 = vmul.f32 %v913_v46, %v913_v46  ;;  %v1195_v50 = vmul.f32 %v954_v47, %v954_v47  ;;  %v3589_v44 = vld [vmem:[#allocation14 + $0x4c] ss:$12 sps:$4 sm:$0xff]   ;;  %v3587_v45 = vld [vmem:[#allocation14 + $0x48] ss:$12 sps:$4 sm:$0xff]   ;;  %v3590_v47 = vld [vmem:[#allocation14 + $0x30] ss:$12 sps:$4 sm:$0xff]  }
 0x1d2   : > { %v915_v51 = vpop.f32.mrf.mxu0  ;;  %v956_v52 = vpop.f32.mrf.mxu1  ;;  %v3592_v46 = vld [vmem:[#allocation14 + $0x34] ss:$12 sps:$4 sm:$0xff]  }
 0x1d3   : > { %v1201_v53 = vmax.f32 %v1196_v48, 1e-07  ;;  %v1197_v54 = vadd.f32 %v1195_v50, %v1193_v49  ;;  %v3595_v48 = vld [vmem:[#allocation14 + $0x1c] ss:$12 sps:$4 sm:$0xff]   ;;  %v3593_v49 = vld [vmem:[#allocation14 + $0x18] ss:$12 sps:$4 sm:$0xff]  }
 0x1d4   : > { %v916_v55 = vpop.f32.mrf.mxu0  ;;  %v957_v56 = vpop.f32.mrf.mxu1  ;;  %v3598_v50 = vld [vmem:[#allocation14 + $0x4] ss:$12 sps:$4 sm:$0xff]   ;;  %v3596_v51 = vld [vmem:[#allocation14] ss:$12 sps:$4 sm:$0xff]  }
 0x1d5   : > { %3671 = vlog2.f32 %v1201_v53  ;;  %v1202_v57 = vmax.f32 %v1197_v54, 1e-07  ;;  %v3601_v52 = vld [vmem:[#allocation14 + $0x16c] ss:$12 sps:$4 sm:$0xff]   ;;  %v3599_v53 = vld [vmem:[#allocation14 + $0x168] ss:$12 sps:$4 sm:$0xff]  }
 0x1d6   : > { %v3604_v54 = vld [vmem:[#allocation14 + $0x154] ss:$12 sps:$4 sm:$0xff]   ;;  %v3602_v55 = vld [vmem:[#allocation14 + $0x150] ss:$12 sps:$4 sm:$0xff]  }
 0x1d7   : > { %3673 = vlog2.f32 %v1202_v57  ;;  %v3607_v56 = vld [vmem:[#allocation14 + $0x13c] ss:$12 sps:$4 sm:$0xff]   ;;  %v3605_v57 = vld [vmem:[#allocation14 + $0x138] ss:$12 sps:$4 sm:$0xff]  }
 0x1e2   : > { %v3672_v58 = vpop.eup %3671 }
 0x1e3   : > { %v1204_v60 = vmul.f32 0.6931472, %v3672_v58  ;;  %v3610_v58 = vld [vmem:[#allocation14 + $0x124] ss:$12 sps:$4 sm:$0xff]  }
 0x1e4   : > { %v3674_v59 = vpop.eup %3673 }
 0x1e5   : > { %v1206_v61 = vmul.f32 0.6931472, %v3674_v59  ;;  %v4298_v63 = vpack.c.bf16 %v1204_v60, %v1204_v60  ;;  %v3623_v59 = vld [vmem:[#allocation14 + $0x228] ss:$12 sps:$4 sm:$0xff]   ;;  %v3625_v60 = vld [vmem:[#allocation14 + $0x22c] ss:$12 sps:$4 sm:$0xff]  }
 0x1e6   : > { %2387 = vmatprep.subr.bf16.mxu0 %v3625_v60  ;;  %v3656_v60 = vld [vmem:[#allocation14 + $0xb0] ss:$12 sps:$4 sm:$0xff]  }
 0x1e7   : > { %v1208_v62 = vpack.c.bf16 %v1206_v61, %v1206_v61  ;;  %v3629_v61 = vld [vmem:[#allocation14 + $0x214] ss:$12 sps:$4 sm:$0xff]  }
 0x1e9   : > { %1806 = vmatprep.mubr.bf16.mxu0 %v1208_v62 }
 0x1ea   : > { %1807 = vmatmul.mubr.bf16.vlgmr.msra.gmra.mxu0 %v4298_v63 }
 0x1eb   : > { %2419 = vmatprep.mubr.bf16.mxu0 %v3987_v40  ;;  %v3581_v40 = vld [vmem:[#allocation14 + $0x78] ss:$12 sps:$4 sm:$0xff]   ;;  %2388 = vmatpush1.bf16.msra.mxu0 %v3623_v59 }
 0x1ec   : > { %2389 = vmatprep.subr.bf16.mxu0 %v3629_v61 }
 0x20e   : > { %v1185_v0 = vpop.f32.mrf.mxu0 }
 0x20f   : > { %v1198_v2 = vmul.f32 %v1185_v0, %v1185_v0  ;;  %v3613_v0 = vld [vmem:[#allocation14 + $0x10c] ss:$12 sps:$4 sm:$0xff]  }
 0x210   : > { %v1187_v1 = vpop.f32.mrf.mxu0 }
 0x211   : > { %v1199_v3 = vmul.f32 %v1187_v1, %v1187_v1  ;;  %v3633_v1 = vld [vmem:[#allocation14 + $0x1fc] ss:$12 sps:$4 sm:$0xff]  }
 0x212   : > { %v1189_v4 = vpop.f32.mrf.mxu0 }
 0x213   : > { %v1200_v5 = vadd.f32 %v1199_v3, %v1198_v2  ;;  %v3611_v2 = vld [vmem:[#allocation14 + $0x108] ss:$12 sps:$4 sm:$0xff]   ;;  %v3631_v3 = vld [vmem:[#allocation14 + $0x1f8] ss:$12 sps:$4 sm:$0xff]  }
 0x214   : > { %v1190_v6 = vpop.f32.mrf.mxu0  ;;  %v3616_v4 = vld [vmem:[#allocation14 + $0xf4] ss:$12 sps:$4 sm:$0xff]  }
 0x215   : > { %v1209_v7 = vmax.f32 %v1200_v5, 1e-07  ;;  %v3637_v5 = vld [vmem:[#allocation14 + $0x1e4] ss:$12 sps:$4 sm:$0xff]  }
 0x216   : > { %v3614_v6 = vld [vmem:[#allocation14 + $0xf0] ss:$12 sps:$4 sm:$0xff]  }
 0x217   : > { %3675 = vlog2.f32 %v1209_v7  ;;  %v3635_v7 = vld [vmem:[#allocation14 + $0x1e0] ss:$12 sps:$4 sm:$0xff]  }
 0x224   : > { %v3676_v8 = vpop.eup %3675 }
 0x225   : > { %v1211_v9 = vmul.f32 0.6931472, %v3676_v8  ;;  %v3619_v8 = vld [vmem:[#allocation14 + $0xdc] ss:$12 sps:$4 sm:$0xff]  }
 0x227   : > { %v1212_v11 = vpack.c.bf16 %v1211_v9, %v1211_v9  ;;  %v3641_v9 = vld [vmem:[#allocation14 + $0x1cc] ss:$12 sps:$4 sm:$0xff]  }
 0x229   : > { %1470 = vmatmul.mubr.bf16.vlgmr.msra.gmra.mxu1 %v1212_v11 }
 0x22a   : > { %3175 = vmatpush3.bf16.msra.mxu1 %v3551_v10  ;;  %3190 = vmatprep.mubr.msk.bf16.mxu1 %vm3989_vm0, %v3988_v41  ;;  %v3617_v10 = vld [vmem:[#allocation14 + $0xd8] ss:$12 sps:$4 sm:$0xff]  }
 0x22b   : > { %3176 = vmatprep.subr.bf16.mxu1 %v3988_v41 }
 0x22e   : > { %3177 = vmatpush3.bf16.msra.mxu1 %v3552_v12  ;;  %v3622_v12 = vld [vmem:[#allocation14 + $0xc4] ss:$12 sps:$4 sm:$0xff]  }
 0x22f   : > { %3178 = vmatprep.subr.bf16.mxu1 %v3988_v41 }
 0x232   : > { %3179 = vmatpush3.bf16.msra.mxu1 %v3553_v13  ;;  %v3645_v13 = vld [vmem:[#allocation14 + $0x1b4] ss:$12 sps:$4 sm:$0xff]  }
 0x233   : > { %3180 = vmatprep.subr.bf16.mxu1 %v3988_v41 }
 0x236   : > { %3181 = vmatpush3.bf16.msra.mxu1 %v3554_v14  ;;  %v3620_v14 = vld [vmem:[#allocation14 + $0xc0] ss:$12 sps:$4 sm:$0xff]  }
 0x237   : > { %3182 = vmatprep.subr.bf16.mxu1 %v3988_v41 }
 0x23a   : > { %3183 = vmatpush3.bf16.msra.mxu1 %v3555_v15  ;;  %v3643_v15 = vld [vmem:[#allocation14 + $0x1b0] ss:$12 sps:$4 sm:$0xff]  }
 0x23b   : > { %3184 = vmatprep.subr.bf16.mxu1 %v3988_v41 }
 0x23e   : > { %3185 = vmatpush3.bf16.msra.mxu1 %v3556_v16  ;;  %v3649_v16 = vld [vmem:[#allocation14 + $0x19c] ss:$12 sps:$4 sm:$0xff]  }
 0x23f   : > { %3186 = vmatprep.subr.bf16.mxu1 %v3988_v41 }
 0x242   : > { %3187 = vmatpush3.bf16.msra.mxu1 %v3557_v17 }
 0x243   : > { %3188 = vmatprep.subr.bf16.mxu1 %v3988_v41 }
 0x246   : > { %3189 = vmatpush3.bf16.msra.mxu1 %v3558_v18  ;;  %v3647_v18 = vld [vmem:[#allocation14 + $0x198] ss:$12 sps:$4 sm:$0xff]  }
 0x247   : > { %3121 = vmatprep.subr.bf16.mxu1 %v3559_v19 }
 0x249   : > { %3191 = vmatmul.mubr.bf16.vlgmr.msra.gmra.mxu1 %v1212_v11  ;;  %v3639_v11 = vld [vmem:[#allocation14 + $0x1c8] ss:$12 sps:$4 sm:$0xff]  }
 0x24a   : > { %3122 = vmatpush3.bf16.msra.mxu1 %v3560_v20  ;;  %1847 = vmatprep.mubr.bf16.mxu1 %v1208_v62  ;;  %v3608_v62 = vld [vmem:[#allocation14 + $0x120] ss:$12 sps:$4 sm:$0xff]   ;;  %v3653_v20 = vld [vmem:[#allocation14 + $0x184] ss:$12 sps:$4 sm:$0xff]  }
 0x24b   : > { %3123 = vmatprep.subr.bf16.mxu1 %v3561_v21 }
 0x24e   : > { %3124 = vmatpush3.bf16.msra.mxu1 %v3562_v22  ;;  %v3651_v22 = vld [vmem:[#allocation14 + $0x180] ss:$12 sps:$4 sm:$0xff]  }
 0x24f   : > { %3125 = vmatprep.subr.bf16.mxu1 %v3563_v23 }
 0x252   : > { %3126 = vmatpush3.bf16.msra.mxu1 %v3564_v24  ;;  %v3655_v24 = vld [vmem:[#allocation14 + $0x170] ss:$12 sps:$4 sm:$0xff]  }
 0x253   : > { %3127 = vmatprep.subr.bf16.mxu1 %v3565_v25  ;;  %v1855_v25 = vld [vmem:[%s4275_s13] sm:$0xff] }
 0x256   : > { %3128 = vmatpush3.bf16.msra.mxu1 %v3566_v26 }
 0x257   : > { %3129 = vmatprep.subr.bf16.mxu1 %v3567_v27  ;;  %v1857_v27 = vunpack.c.l.bf16 %v1855_v25 }
 0x25a   : > { %3130 = vmatpush3.bf16.msra.mxu1 %v3568_v28 }
 0x25b   : > { %3131 = vmatprep.subr.bf16.mxu1 %v3569_v29  ;;  %v1858_v29 = vunpack.c.h.bf16 %v1855_v25 }
 0x25e   : > { %3132 = vmatpush3.bf16.msra.mxu1 %v3570_v30 }
 0x25f   : > { %3133 = vmatprep.subr.bf16.mxu1 %v3571_v31 }
 0x262   : > { %3134 = vmatpush3.bf16.msra.mxu1 %v3572_v32 }
 0x263   : > { %3135 = vmatprep.subr.bf16.mxu1 %v3573_v33 }
 0x266   : > { %3136 = vmatpush3.bf16.msra.mxu1 %v3574_v34 }
 0x267   : > { %2346 = vmatprep.subr.bf16.mxu1 %v3577_v35 }
 0x269   : > { %1848 = vmatmul.mubr.bf16.vlgmr.msra.gmra.mxu1 %v4298_v63  ;;  %v3627_v63 = vld [vmem:[#allocation14 + $0x210] ss:$12 sps:$4 sm:$0xff]  }
 0x26a   : > { %2347 = vmatpush1.bf16.msra.mxu1 %v3575_v36  ;;  %2390 = vmatpush1.bf16.msra.mxu0 %v3627_v63  ;;  %v3658_v63 = vld [vmem:[#allocation14 + $0x98] ss:$12 sps:$4 sm:$0xff]  }
 0x26b   : > { %2348 = vmatprep.subr.bf16.mxu1 %v3580_v37  ;;  %2391 = vmatprep.subr.bf16.mxu0 %v3633_v1  ;;  %v3626_v37 = vld [vmem:[#allocation14 + $0x230] ss:$12 sps:$4 sm:$0xff]   ;;  %v3660_v1 = vld [vmem:[#allocation14 + $0x80] ss:$12 sps:$4 sm:$0xff]  }
 0x26e   : > { %2349 = vmatpush1.bf16.msra.mxu1 %v3578_v38  ;;  %2392 = vmatpush1.bf16.msra.mxu0 %v3631_v3  ;;  %v3662_v3 = vld [vmem:[#allocation14 + $0x68] ss:$12 sps:$4 sm:$0xff]  }
 0x26f   : > { %2350 = vmatprep.subr.bf16.mxu1 %v3583_v39  ;;  %2393 = vmatprep.subr.bf16.mxu0 %v3637_v5  ;;  %v3630_v39 = vld [vmem:[#allocation14 + $0x218] ss:$12 sps:$4 sm:$0xff]   ;;  %v3664_v5 = vld [vmem:[#allocation14 + $0x50] ss:$12 sps:$4 sm:$0xff]  }
 0x272   : > { %2351 = vmatpush1.bf16.msra.mxu1 %v3581_v40  ;;  %2394 = vmatpush1.bf16.msra.mxu0 %v3635_v7  ;;  %v3634_v40 = vld [vmem:[#allocation14 + $0x200] ss:$12 sps:$4 sm:$0xff]   ;;  %v3666_v7 = vld [vmem:[#allocation14 + $0x38] ss:$12 sps:$4 sm:$0xff]  }
 0x273   : > { %2352 = vmatprep.subr.bf16.mxu1 %v3586_v42  ;;  %2395 = vmatprep.subr.bf16.mxu0 %v3641_v9  ;;  %v3638_v42 = vld [vmem:[#allocation14 + $0x1e8] ss:$12 sps:$4 sm:$0xff]   ;;  %v3668_v9 = vld [vmem:[#allocation14 + $0x20] ss:$12 sps:$4 sm:$0xff]  }
 0x276   : > { %2353 = vmatpush1.bf16.msra.mxu1 %v3584_v43  ;;  %2396 = vmatpush1.bf16.msra.mxu0 %v3639_v11  ;;  %v3642_v43 = vld [vmem:[#allocation14 + $0x1d0] ss:$12 sps:$4 sm:$0xff]   ;;  %v3670_v11 = vld [vmem:[#allocation14 + $0x8] ss:$12 sps:$4 sm:$0xff]  }
 0x277   : > { %2354 = vmatprep.subr.bf16.mxu1 %v3589_v44  ;;  %2397 = vmatprep.subr.bf16.mxu0 %v3645_v13  ;;  %v3646_v44 = vld [vmem:[#allocation14 + $0x1b8] ss:$12 sps:$4 sm:$0xff]  }
 0x27a   : > { %2355 = vmatpush1.bf16.msra.mxu1 %v3587_v45  ;;  %2398 = vmatpush1.bf16.msra.mxu0 %v3643_v15  ;;  %v3650_v45 = vld [vmem:[#allocation14 + $0x1a0] ss:$12 sps:$4 sm:$0xff]  }
 0x27b   : > { %2356 = vmatprep.subr.bf16.mxu1 %v3592_v46  ;;  %2399 = vmatprep.subr.bf16.mxu0 %v3649_v16 }
 0x27e   : > { %2357 = vmatpush1.bf16.msra.mxu1 %v3590_v47  ;;  %2400 = vmatpush1.bf16.msra.mxu0 %v3647_v18 }
 0x27f   : > { %2358 = vmatprep.subr.bf16.mxu1 %v3595_v48  ;;  %2401 = vmatprep.subr.bf16.mxu0 %v3653_v20  ;;  %v3654_v48 = vld [vmem:[#allocation14 + $0x188] ss:$12 sps:$4 sm:$0xff]  }
 0x282   : > { %2359 = vmatpush1.bf16.msra.mxu1 %v3593_v49  ;;  %2402 = vmatpush1.bf16.msra.mxu0 %v3651_v22 }
 0x283   : > { %2360 = vmatprep.subr.bf16.mxu1 %v3598_v50  ;;  %3143 = vmatprep.subr.bf16.mxu0 %v3655_v24  ;;  %v3990_v24 = vmov 1983009808  }
 0x284   : > { %v2514_v25 = vunpack.c.l.s4 %v3990_v24 }
 0x286   : > { %2361 = vmatpush1.bf16.msra.mxu1 %v3596_v51 }
 0x287   : > { %2362 = vmatprep.subr.bf16.mxu1 %v3601_v52  ;;  %v1856_v52 = vld [vmem:[%s4275_s13 + $0x8] sm:$0xf] }
 0x28a   : > { %2363 = vmatpush2.bf16.msra.mxu1 %v3599_v53 }
 0x28b   : > { %2364 = vmatprep.subr.bf16.mxu1 %v3604_v54 }
 0x28e   : > { %2365 = vmatpush2.bf16.msra.mxu1 %v3602_v55  ;;  %v1859_v55 = vunpack.c.l.bf16 %v1856_v52 }
 0x28f   : > { %2366 = vmatprep.subr.bf16.mxu1 %v3607_v56 }
 0x292   : > { %2367 = vmatpush2.bf16.msra.mxu1 %v3605_v57 }
 0x293   : > { %2368 = vmatprep.subr.bf16.mxu1 %v3610_v58 }
 0x296   : > { %2369 = vmatpush2.bf16.msra.mxu1 %v3608_v62  ;;  %v3657_v62 = vld [vmem:[#allocation14 + $0x158] ss:$12 sps:$4 sm:$0xff]  }
 0x297   : > { %2370 = vmatprep.subr.bf16.mxu1 %v3613_v0  ;;  %v3659_v0 = vld [vmem:[#allocation14 + $0x140] ss:$12 sps:$4 sm:$0xff]  }
 0x29a   : > { %2371 = vmatpush2.bf16.msra.mxu1 %v3611_v2  ;;  %v3661_v2 = vld [vmem:[#allocation14 + $0x128] ss:$12 sps:$4 sm:$0xff]  }
 0x29b   : > { %2372 = vmatprep.subr.bf16.mxu1 %v3616_v4  ;;  %v3663_v4 = vld [vmem:[#allocation14 + $0x110] ss:$12 sps:$4 sm:$0xff]  }
 0x29e   : > { %2373 = vmatpush2.bf16.msra.mxu1 %v3614_v6  ;;  %v3665_v6 = vld [vmem:[#allocation14 + $0xf8] ss:$12 sps:$4 sm:$0xff]  }
 0x29f   : > { %2374 = vmatprep.subr.bf16.mxu1 %v3619_v8  ;;  %v3667_v8 = vld [vmem:[#allocation14 + $0xe0] ss:$12 sps:$4 sm:$0xff]  }
 0x2a2   : > { %2375 = vmatpush2.bf16.msra.mxu1 %v3617_v10  ;;  %v3669_v10 = vld [vmem:[#allocation14 + $0xc8] ss:$12 sps:$4 sm:$0xff]  }
 0x2a3   : > { %2376 = vmatprep.subr.bf16.mxu1 %v3622_v12 }
 0x2a6   : > { %2377 = vmatpush2.bf16.msra.mxu1 %v3620_v14 }
 0x2a7   : > { %3194 = vmatprep.subr.bf16.mxu1 %v3988_v41 }
 0x2aa   : > { %v1808_v17 = vpop.f32.mrf.mxu0 }
 0x2ac   : > { %v1810_v19 = vpop.f32.mrf.mxu0 }
 0x2ae   : > { %v1812_v21 = vpop.f32.mrf.mxu0 }
 0x2b0   : > { %v1813_v23 = vpop.f32.mrf.mxu0 }
 0x2e9   : > { %v1471_v26 = vpop.f32.mrf.mxu1 }
 0x2ea   : > { %v1809_v28 = vadd.f32 %v1808_v17, %v1471_v26 }
 0x2eb   : > { %v1473_v30 = vpop.f32.mrf.mxu1 }
 0x2ec   : > { %v1811_v31 = vadd.f32 %v1810_v19, %v1473_v30  ;;  %v1860_v32 = vmul.f32 %v1857_v27, %v1809_v28  ;;  %v2516_v27 = vlaneseq  ;;  %v3991_v30 = vmov 1934713408  }
 0x2ed   : > { %v1475_v33 = vpop.f32.mrf.mxu1 }
 0x2ee   : > { %v1861_v34 = vmul.f32 %v1858_v29, %v1811_v31  ;;  %v4313_v38 = vpack.c.bf16 %v1860_v32, %v1860_v32  ;;  %v2515_v29 = vunpack.c.0.s8 %v2514_v25  ;;  %v2545_v31 = vunpack.c.l.s4 %v3991_v30 }
 0x2ef   : > { %v1476_v35 = vpop.f32.mrf.mxu1 }
 0x2f0   : > { %v1864_v36 = vpack.c.bf16 %v1861_v34, %v1861_v34  ;;  %v2517_v35 = vshrl.u32 %v2516_v27, 7 }
 0x2f2   : > { %2378 = vmatprep.mubr.bf16.mxu1 %v1864_v36 }
 0x2f3   : > { %2379 = vmatmul.mubr.bf16.vlgmr.msra.gmra.mxu1 %v4313_v38 }
 0x2f4   : > { %3195 = vmatpush3.bf16.msra.mxu1 %v3626_v37  ;;  %3210 = vmatprep.mubr.msk.bf16.mxu1 %vm3989_vm0, %v3988_v41 }
 0x2f5   : > { %3196 = vmatprep.subr.bf16.mxu1 %v3988_v41 }
 0x2f8   : > { %3197 = vmatpush3.bf16.msra.mxu1 %v3630_v39  ;;  %v2546_v39 = vunpack.c.0.s8 %v2545_v31 }
 0x2f9   : > { %3198 = vmatprep.subr.bf16.mxu1 %v3988_v41 }
 0x2fc   : > { %3199 = vmatpush3.bf16.msra.mxu1 %v3634_v40 }
 0x2fd   : > { %3200 = vmatprep.subr.bf16.mxu1 %v3988_v41 }
 0x300   : > { %3201 = vmatpush3.bf16.msra.mxu1 %v3638_v42 }
 0x301   : > { %3202 = vmatprep.subr.bf16.mxu1 %v3988_v41 }
 0x304   : > { %3203 = vmatpush3.bf16.msra.mxu1 %v3642_v43  ;;  %v2518_v43 = vsub.s32 %v2515_v29, %v2517_v35 }
 0x305   : > { %3204 = vmatprep.subr.bf16.mxu1 %v3988_v41 }
 0x308   : > { %3205 = vmatpush3.bf16.msra.mxu1 %v3646_v44 }
 0x309   : > { %v1512_v46 = vpop.f32.mrf.mxu1  ;;  %3206 = vmatprep.subr.bf16.mxu1 %v3988_v41 }
 0x30b   : > { %v3192_v47 = vpop.f32.mrf.mxu1 }
 0x30c   : > { %3207 = vmatpush3.bf16.msra.mxu1 %v3650_v45 }
 0x30d   : > { %v1515_v49 = vpop.f32.mrf.mxu1  ;;  %3208 = vmatprep.subr.bf16.mxu1 %v3988_v41 }
 0x30f   : > { %v3193_v50 = vpop.f32.mrf.mxu1 }
 0x310   : > { %3209 = vmatpush3.bf16.msra.mxu1 %v3654_v48  ;;  %v2549_v48 = vsub.s32 %v2546_v39, %v2517_v35 }
 0x329   : > { %v3137_v51 = vpop.f32.mrf.mxu1 }
 0x32b   : > { %v3138_v53 = vpop.f32.mrf.mxu1 }
 0x32c   : > { %v3139_v54 = vadd.f32 %v3138_v53, %v3137_v51 }
 0x32d   : > { %v3140_v56 = vpop.f32.mrf.mxu1 }
 0x32e   : > { %v1850_v57 = vadd.f32 %v3139_v54, %v1512_v46 }
 0x32f   : > { %v3141_v58 = vpop.f32.mrf.mxu1 }
 0x330   : > { %v1862_v59 = vmul.f32 %v1859_v55, %v1850_v57 }
 0x332   : > { %v1865_v61 = vpack.c.bf16 %v1862_v59, %v1862_v59 }
 0x334   : > { %2420 = vmatmul.mubr.bf16.vlgmr.msra.gmra.mxu0 %v1865_v61  ;;  %3211 = vmatmul.mubr.bf16.vlgmr.msra.gmra.mxu1 %v1865_v61 }
 0x335   : > { %3144 = vmatpush3.bf16.msra.mxu0 %v3656_v60  ;;  %2460 = vmatprep.mubr.bf16.mxu0 %v1864_v36 }
 0x336   : > { %3145 = vmatprep.subr.bf16.mxu0 %v3657_v62 }
 0x339   : > { %3146 = vmatpush3.bf16.msra.mxu0 %v3658_v63 }
 0x33a   : > { %3147 = vmatprep.subr.bf16.mxu0 %v3659_v0 }
 0x33d   : > { %3148 = vmatpush3.bf16.msra.mxu0 %v3660_v1 }
 0x33e   : > { %3149 = vmatprep.subr.bf16.mxu0 %v3661_v2 }
 0x341   : > { %3150 = vmatpush3.bf16.msra.mxu0 %v3662_v3 }
 0x342   : > { %3151 = vmatprep.subr.bf16.mxu0 %v3663_v4 }
 0x345   : > { %3152 = vmatpush3.bf16.msra.mxu0 %v3664_v5 }
 0x346   : > { %3153 = vmatprep.subr.bf16.mxu0 %v3665_v6 }
 0x349   : > { %3154 = vmatpush3.bf16.msra.mxu0 %v3666_v7 }
 0x34a   : > { %3155 = vmatprep.subr.bf16.mxu0 %v3667_v8 }
 0x34d   : > { %3156 = vmatpush3.bf16.msra.mxu0 %v3668_v9 }
 0x34e   : > { %3157 = vmatprep.subr.bf16.mxu0 %v3669_v10 }
 0x351   : > { %3158 = vmatpush3.bf16.msra.mxu0 %v3670_v11 }
 0x354   : > { %2461 = vmatmul.mubr.bf16.vlgmr.msra.gmra.mxu0 %v4313_v38 }
 0x3b3   : > { %v2380_v12 = vpop.f32.mrf.mxu1 }
 0x3b5   : > { %v2382_v13 = vpop.f32.mrf.mxu1 }
 0x3b7   : > { %v2384_v14 = vpop.f32.mrf.mxu1 }
 0x3b9   : > { %v2385_v15 = vpop.f32.mrf.mxu1 }
 0x3f4   : > { %v2421_v16 = vpop.f32.mrf.mxu0  ;;  %v2502_v17 = vpop.f32.mrf.mxu1 }
 0x3f5   : > { %v2422_v33 = vadd.f32 %v2421_v16, %v2380_v12 }
 0x3f6   : > { %v2423_v18 = vpop.f32.mrf.mxu0  ;;  %v3212_v19 = vpop.f32.mrf.mxu1 }
 0x3f7   : > { %v2424_v26 = vadd.f32 %v2423_v18, %v2382_v13  ;;  %v2508_v42 = vand.u32 2147483647, %v2422_v33 }
 0x3f8   : > { %v2425_v20 = vpop.f32.mrf.mxu0  ;;  %v2505_v21 = vpop.f32.mrf.mxu1 }
 0x3f9   : > { %v2509_v34 = vand.u32 2147483647, %v2424_v26 }
 0x3fa   : > { %v2426_v22 = vpop.f32.mrf.mxu0  ;;  %v3213_v23 = vpop.f32.mrf.mxu1 }
 0x3fb   : > { %v2527_v44 = vcombine.high %v2509_v34, %v3988_v41  ;;  %v2534_v49 = vrot.slane %v2509_v34, %v2518_v43 }
 0x3fd   : > { %v2541_v50 = vrot.slane %v2527_v44, %v2518_v43 }
 0x414   : > { %v3159_v28 = vpop.f32.mrf.mxu0 }
 0x416   : > { %v3160_v32 = vpop.f32.mrf.mxu0 }
 0x417   : > { %v3161_v36 = vadd.f32 %v3160_v32, %v3159_v28 }
 0x418   : > { %v3162_v37 = vpop.f32.mrf.mxu0 }
 0x419   : > { %v2503_v38 = vadd.f32 %v3161_v36, %v2502_v17 }
 0x41a   : > { %v3163_v40 = vpop.f32.mrf.mxu0 }
 0x41b   : > { %v2510_v45 = vand.u32 2147483647, %v2503_v38 }
 0x41d   : > { %v2511_v46 = vcombine.low %v2508_v42, %v2510_v45  ;;  %v2512_v47 = vcombine.high %v2508_v42, %v2510_v45 }
 0x41f   : > { %v2519_v51 = vrot.slane %v2511_v46, %v2518_v43  ;;  %v2526_v52 = vrot.slane %v2512_v47, %v2518_v43 }
 0x421   : > { %v2542_v53 = vcombine.low %v2519_v51, %v2534_v49  ;;  %v2543_v54 = vcombine.high %v2519_v51, %v2534_v49  ;;  %v2558_v55 = vcombine.low %v2526_v52, %v2541_v50  ;;  %v2559_v56 = vcombine.high %v2526_v52, %v2541_v50 }
 0x423   : > { %v2550_v57 = vrot.slane %v2542_v53, %v2549_v48  ;;  %v2557_v58 = vrot.slane %v2543_v54, %v2549_v48  ;;  %v2566_v59 = vrot.slane %v2558_v55, %v2549_v48  ;;  %v2573_v60 = vrot.slane %v2559_v56, %v2549_v48 }
 0x425   : > { %v2574_v61 = vcombine.high %v2550_v57, %v3988_v41  ;;  %v2575_v62 = vcombine.high %v2557_v58, %v3988_v41  ;;  %v2576_v63 = vcombine.high %v2566_v59, %v3988_v41  ;;  %v2577_v0 = vcombine.high %v2573_v60, %v3988_v41 }
 0x426   : > { %v2587_v1 = vsel %vm2586_vm1, %v2550_v57, 0.0  ;;  %v2601_v2 = vsel %vm2586_vm1, %v2557_v58, 0.0  ;;  %v2615_v3 = vsel %vm2586_vm1, %v2566_v59, 0.0  ;;  %v2629_v4 = vsel %vm2586_vm1, %v2573_v60, 0.0 }
 0x427   : > { %v2588_v5 = vrot.slane %v2587_v1, 4  ;;  %v2594_v6 = vsel %vm2586_vm1, %v2574_v61, 0.0  ;;  %v2602_v7 = vrot.slane %v2601_v2, 4  ;;  %v2608_v8 = vsel %vm2586_vm1, %v2575_v62, 0.0 }
 0x428   : > { %v2595_v9 = vrot.slane %v2594_v6, 4  ;;  %v2609_v10 = vrot.slane %v2608_v8, 4  ;;  %v2616_v11 = vrot.slane %v2615_v3, 4  ;;  %v2622_v12 = vsel %vm2586_vm1, %v2576_v63, 0.0 }
 0x429   : > { %v2589_v41 = vadd.f32 %v2588_v5, %v2587_v1  ;;  %v2603_v13 = vadd.f32 %v2602_v7, %v2601_v2  ;;  %v2623_v14 = vrot.slane %v2622_v12, 4  ;;  %v2630_v15 = vrot.slane %v2629_v4, 4 }
 0x42a   : > { %v2596_v16 = vadd.f32 %v2595_v9, %v2594_v6  ;;  %v2610_v17 = vadd.f32 %v2609_v10, %v2608_v8  ;;  %v2617_v18 = vadd.f32 %v2616_v11, %v2615_v3  ;;  %v2636_v19 = vsel %vm2586_vm1, %v2577_v0, 0.0 }
 0x42b   : > { %v2590_v20 = vrot.slane %v2589_v41, 2  ;;  %v2604_v21 = vrot.slane %v2603_v13, 2  ;;  %v2624_v22 = vadd.f32 %v2623_v14, %v2622_v12  ;;  %v2631_v23 = vadd.f32 %v2630_v15, %v2629_v4 }
 0x42c   : > { %v2597_v24 = vrot.slane %v2596_v16, 2  ;;  %v2611_v25 = vrot.slane %v2610_v17, 2  ;;  %v2618_v26 = vrot.slane %v2617_v18, 2  ;;  %v2637_v27 = vrot.slane %v2636_v19, 4 }
 0x42d   : > { %v2591_v28 = vadd.f32 %v2590_v20, %v2589_v41  ;;  %v2605_v29 = vadd.f32 %v2604_v21, %v2603_v13  ;;  %v2625_v30 = vrot.slane %v2624_v22, 2  ;;  %v2632_v31 = vrot.slane %v2631_v23, 2 }
 0x42e   : > { %v2598_v32 = vadd.f32 %v2597_v24, %v2596_v16  ;;  %v2612_v33 = vadd.f32 %v2611_v25, %v2610_v17  ;;  %v2619_v34 = vadd.f32 %v2618_v26, %v2617_v18  ;;  %v2638_v35 = vadd.f32 %v2637_v27, %v2636_v19 }
 0x42f   : > { %v2592_v36 = vrot.slane %v2591_v28, 1  ;;  %v2606_v37 = vrot.slane %v2605_v29, 1  ;;  %v2626_v38 = vadd.f32 %v2625_v30, %v2624_v22  ;;  %v2633_v39 = vadd.f32 %v2632_v31, %v2631_v23 }
 0x430   : > { %v2599_v40 = vrot.slane %v2598_v32, 1  ;;  %v2613_v42 = vrot.slane %v2612_v33, 1  ;;  %v2639_v43 = vrot.slane %v2638_v35, 2  ;;  %v2620_v44 = vrot.slane %v2619_v34, 1 }
 0x431   : > { %v2593_v45 = vadd.f32 %v2592_v36, %v2591_v28  ;;  %v2627_v47 = vrot.slane %v2626_v38, 1  ;;  %v2607_v49 = vadd.f32 %v2606_v37, %v2605_v29  ;;  %v2634_v50 = vrot.slane %v2633_v39, 1 }
 0x432   : > { %v2600_v46 = vadd.f32 %v2599_v40, %v2598_v32  ;;  %v2640_v48 = vadd.f32 %v2639_v43, %v2638_v35  ;;  %v2614_v51 = vadd.f32 %v2613_v42, %v2612_v33  ;;  %v2621_v54 = vadd.f32 %v2620_v44, %v2619_v34 }
 0x433   : > { %v2628_v56 = vadd.f32 %v2627_v47, %v2626_v38  ;;  %v2635_v58 = vadd.f32 %v2634_v50, %v2633_v39 }
 0x434   : > { %v2641_v52 = vrot.slane %v2640_v48, 1  ;;  %v2652_v53 = vsel %vm2651_vm2, %v2600_v46, %v2593_v45 }
 0x435   : > { %v2654_v55 = vsel %vm2653_vm3, %v2607_v49, %v2652_v53 }
 0x436   : > { %v2656_v57 = vsel %vm2655_vm4, %v2614_v51, %v2654_v55  ;;  %v2642_v60 = vadd.f32 %v2641_v52, %v2640_v48 }
 0x437   : > { %v2658_v59 = vsel %vm2657_vm5, %v2621_v54, %v2656_v57 }
 0x438   : > { %v2660_v61 = vsel %vm2659_vm6, %v2628_v56, %v2658_v59 }
 0x439   : > { %v2662_v62 = vsel %vm2661_vm7, %v2635_v58, %v2660_v61 }
 0x43a   : > { %v2664_v63 = vsel %vm2663_vm8, %v2642_v60, %v2662_v62 }
 0x43b   : > { %2666 = vst [vmem:[%s467_s24] sm:$0xff] %v2664_v63 }
 0x43c   : > { %3904 = shalt.err (!%p3901_p10)
}
 0x43d   : > { %s3905_s22 = scalar_lea.hbm %s4345_s25, 128  ;;  %s3909_s4 = scalar_lea.hbm %s4390_s8, 256 }
 0x43e   : > { %p3906_p1 = scmp.ne.s32.totalorder %s4345_s25, %s3905_s22  ;;  %p3910_p9 = scmp.lt.s32.totalorder %s4345_s25, %s4390_s8 }
 0x43f   : > { %p3911_p4 = scmp.lt.s32.totalorder %s3909_s4, %s3905_s22 }
 0x440   : > { %p3907_p5 = pnand %p3906_p1, %p4450_p11 }
 0x441   : > { %p3912_p7 = por %p3911_p4, %p3910_p9 }
 0x442   : > { %p3908_p8 = pneg %p3907_p5 }
 0x444   : > { %p3913_p2 = pnand %p3912_p7, %p3908_p8 }
 0x446   : > { %3916 = shalt.err (!%p3913_p2)
}
 0x447   : > { %3243 = dma.vmem_to_hbm [thread:$0]  (%p4450_p11), %s2682_s16, 128, %s4345_s25, %s2668_s9  }
 0x448 PF: > { %s4451_s29 = sld [smem:[#allocation26_spill]]  ;;  %s2693_s12 = sand.u32 1, %s3959_s27  }
 0x449   : > { %p4453_p6 = scmp.ge.s32.totalorder %s3971_s30, 2  ;;  %s2694_s26 = scalar_lea.sflag [#allocation4], %s2693_s12 }
 0x44e   : > { %p4452_p13 = scmp.ne.s32.totalorder %s4451_s29, 0 }
 0x450   : > { %p3272_p12 = pnand %p4453_p6, %p4452_p13 }
 0x452   : > { %p3273_p3 = pneg %p3272_p12 }
 0x454   : > { %3954 = dma.done.wait (%p3273_p3), %s2694_s26, 128  }
 0x455   : > { %3956 = vsyncadd (%p3273_p3), %s2694_s26, 4294967168  ;;  %s4454_s30 = sld [smem:[#allocation24_spill]]  ;;  %s4457_s27 = smov %s3963_s28 }
 0x456   : > { %s4455_s1 = sld [smem:[#allocation23_spill]] }
 0x457   : > { %s4456_s29 = sld [smem:[#allocation25_spill]] }
 0x45b   : > { %p27_p0 = scmp.ge.s32.totalorder %s4454_s30, 4  }
 0x45c   : > { %s4458_s28 = smov %s4455_s1 }
 0x45d   :  { %29 = sbr.rel (!%p27_p0) target bundleno = 16 (0x10), region = 141 }
 0x462   :  { %2699 = vsyncpa [#allocation3], 1 }
 0x463   :  { %2701 = vsyncpa [#allocation3 + $0x1], 1 }
 0x464   :  { %2702 = vsyncpa [#allocation6], 1 }
 0x465   :  { %2704 = vsyncpa [#allocation6 + $0x1], 1 }
 0x466   :  { %2705 = vsyncpa [#allocation9], 1 }
 0x467   :  { %2706 = vsyncpa [#allocation12], 1 }
 0x468   :  { %2707 = vsyncpa [#allocation15], 1 }
 0x469   :  { %2708 = vsyncpa [#allocation4], 1 }
 0x46a   :  { %2710 = vsyncpa [#allocation4 + $0x1], 1 }

</bundles_post_ra>
